<compile_context>
chip_gen: v7x
topology: tpu7x:2x2x1
jax: 0.10.0
libtpu: 0.0.40
codegen_flags: <defaults>
</compile_context>

<pallas_src>
import jax
import jax.numpy as jnp
from jax.experimental import pallas as pl
from jax.experimental.pallas import tpu as pltpu


# ---------------------------------------------------------------------------
# Wrapper-side weight preprocessing (tiny, pure XLA)
# ---------------------------------------------------------------------------
def _conv_toeplitz(w, w_in):
    """Banded matrix turning a KxK 'valid' conv over an (H, W*Cin) row-major
    activation into one matmul plus K shifted-row adds.

    w: (Cout, Cin, K, K) PyTorch conv weight.
    Returns T of shape (w_in*Cin, K*Wo*Cout) with
      row index    = wi*Cin + ci
      column index = di*(Wo*Cout) + parity*((Wo//2)*Cout) + half*Cout + co
    where wo = 2*half + parity (parity-major ordering makes the later 2x
    width max-pool a single lane-block max).
    """
    cout, cin, kh, kw = w.shape
    wo_n = w_in - kw + 1
    wi = jnp.arange(w_in)[:, None]
    wo = jnp.arange(wo_n)[None, :]
    dj = wi - wo
    valid = (dj >= 0) & (dj < kw)
    djc = jnp.clip(dj, 0, kw - 1)
    w_t = jnp.transpose(w, (1, 2, 3, 0))            # (Cin, K, K, Cout)
    g = w_t[:, :, djc, :]                           # (Cin, K, w_in, Wo, Cout)
    g = jnp.where(valid[None, None, :, :, None], g, 0.0)
    g = g.reshape(cin, kh, w_in, wo_n // 2, 2, cout)
    g = jnp.transpose(g, (2, 0, 1, 4, 3, 5))        # (wi, ci, di, parity, half, co)
    return g.reshape(w_in * cin, kh * wo_n * cout)


def _fc_weights(params, hp2, wp2, c2, nf=128):
    """Permute fc1 columns from PyTorch flatten order (co, ho, wo) to the
    kernel's (ho, wo, co) order, transpose all FC weights to (in, out) and
    zero-pad the in/out dims to 128 lanes."""
    ho, wo, co = jnp.meshgrid(jnp.arange(hp2), jnp.arange(wp2),
                              jnp.arange(c2), indexing="ij")
    k_pt = (co * (hp2 * wp2) + ho * wp2 + wo).reshape(-1)     # (400,)
    d1 = params["fc1_w"].shape[0]   # 120
    d2 = params["fc2_w"].shape[0]   # 84
    d3 = params["fc3_w"].shape[0]   # 10

    wf1 = params["fc1_w"][:, k_pt].T                           # (400, 120)
    wf1p = jnp.pad(wf1, ((0, 0), (0, nf - d1)))
    bf1p = jnp.pad(params["fc1_b"], (0, nf - d1)).reshape(1, nf)
    wf2p = jnp.pad(params["fc2_w"].T, ((0, nf - d1), (0, nf - d2)))
    bf2p = jnp.pad(params["fc2_b"], (0, nf - d2)).reshape(1, nf)
    wf3p = jnp.pad(params["fc3_w"].T, ((0, nf - d2), (0, nf - d3)))
    bf3p = jnp.pad(params["fc3_b"], (0, nf - d3)).reshape(1, nf)
    return (wf1p.astype(jnp.bfloat16), bf1p,
            wf2p.astype(jnp.bfloat16), bf2p,
            wf3p.astype(jnp.bfloat16), bf3p)


# ---------------------------------------------------------------------------
# Fused Pallas kernel (one sample per grid step)
# ---------------------------------------------------------------------------
def _pool_row_pairs(y):
    """Pairwise max over rows: (2R, C) -> (R, C), via static slices + concat."""
    r = y.shape[0] // 2
    rows = [jnp.maximum(y[2 * i:2 * i + 1, :], y[2 * i + 1:2 * i + 2, :])
            for i in range(r)]
    return jnp.concatenate(rows, axis=0)


def _make_lenet_kernel(K, H1, W1, c1, H2, W2, c2, Hp2, N1, N2):
    half1 = (W1 // 2) * c1     # 84
    half2 = (W2 // 2) * c2     # 80
    f32, bf16 = jnp.float32, jnp.bfloat16

    def kernel(x_ref, t1_ref, b1_ref, t2_ref, b2_ref,
               wf1_ref, bf1_ref, wf2_ref, bf2_ref, wf3_ref, bf3_ref, o_ref):
        # ---- conv1: banded matmul over rows + K shifted-row adds ----
        x = x_ref[0]                                                  # (H, W*Cin) bf16
        full1 = jnp.dot(x, t1_ref[...], preferred_element_type=f32)   # (H, K*N1)
        y1 = full1[0:H1, 0:N1]
        for d in range(1, K):
            y1 = y1 + full1[d:d + H1, d * N1:(d + 1) * N1]
        y1 = jnp.tanh(y1 + b1_ref[...])                               # (H1, N1) f32
        # 2x2 max-pool: width = parity lane-block max, height = row pairs.
        yw = jnp.maximum(y1[:, :half1], y1[:, half1:])                # (H1, 84)
        p1 = _pool_row_pairs(yw)                                      # (H1//2, 84)

        # ---- conv2 ----
        full2 = jnp.dot(p1.astype(bf16), t2_ref[...],
                        preferred_element_type=f32)                   # (14, K*N2)
        y2 = full2[0:H2, 0:N2]
        for d in range(1, K):
            y2 = y2 + full2[d:d + H2, d * N2:(d + 1) * N2]
        y2 = jnp.tanh(y2 + b2_ref[...])                               # (H2, N2)
        zw = jnp.maximum(y2[:, :half2], y2[:, half2:])                # (H2, 80)
        p2 = _pool_row_pairs(zw)                                      # (Hp2, 80)

        # ---- flatten (rows -> lanes) + FC stack, 128-padded outputs ----
        fcin = jnp.concatenate([p2[r:r + 1, :] for r in range(Hp2)], axis=1)  # (1, 400)
        h = jnp.tanh(jnp.dot(fcin.astype(bf16), wf1_ref[...],
                             preferred_element_type=f32) + bf1_ref[...])
        h = jnp.tanh(jnp.dot(h.astype(bf16), wf2_ref[...],
                             preferred_element_type=f32) + bf2_ref[...])
        out = jnp.dot(h.astype(bf16), wf3_ref[...],
                      preferred_element_type=f32) + bf3_ref[...]
        o_ref[0] = out                                                # (1, 128) f32

    return kernel


# ---------------------------------------------------------------------------
# LeNet5 forward
# ---------------------------------------------------------------------------
def lenet5_forward(x_nchw, params):
    B, cin, H, W = x_nchw.shape
    K = 5
    c1 = params["conv1_w"].shape[0]            # 6
    c2 = params["conv2_w"].shape[0]            # 16
    H1, W1 = H - K + 1, W - K + 1              # 28, 28
    Hp1, Wp1 = H1 // 2, W1 // 2                # 14, 14
    H2, W2 = Hp1 - K + 1, Wp1 - K + 1          # 10, 10
    Hp2, Wp2 = H2 // 2, W2 // 2                # 5, 5
    N1, N2 = W1 * c1, W2 * c2                  # 168, 160
    NF = 128
    n_cls = params["fc3_w"].shape[0]           # 10

    # Input as (B, H, W*Cin) row-major, bf16 for the MXU.
    x2 = jnp.transpose(x_nchw, (0, 2, 3, 1)).reshape(B, H, W * cin)
    x2 = x2.astype(jnp.bfloat16)

    # Weight preprocessing (batch-independent; constant-folds for fixed params).
    t1 = _conv_toeplitz(params["conv1_w"], W).astype(jnp.bfloat16)      # (96, 840)
    t2 = _conv_toeplitz(params["conv2_w"], Wp1).astype(jnp.bfloat16)    # (84, 800)
    b1e = jnp.tile(params["conv1_b"], W1).reshape(1, N1)
    b2e = jnp.tile(params["conv2_b"], W2).reshape(1, N2)
    wf1p, bf1p, wf2p, bf2p, wf3p, bf3p = _fc_weights(params, Hp2, Wp2, c2, NF)

    kernel = _make_lenet_kernel(K, H1, W1, c1, H2, W2, c2, Hp2, N1, N2)

    out = pl.pallas_call(
        kernel,
        out_shape=jax.ShapeDtypeStruct((B, 1, NF), jnp.float32),
        grid=(B,),
        in_specs=[
            pl.BlockSpec((1, H, W * cin), lambda b: (b, 0, 0)),   # per-sample input
            pl.BlockSpec(t1.shape, lambda b: (0, 0)),             # weights: resident
            pl.BlockSpec(b1e.shape, lambda b: (0, 0)),
            pl.BlockSpec(t2.shape, lambda b: (0, 0)),
            pl.BlockSpec(b2e.shape, lambda b: (0, 0)),
            pl.BlockSpec(wf1p.shape, lambda b: (0, 0)),
            pl.BlockSpec(bf1p.shape, lambda b: (0, 0)),
            pl.BlockSpec(wf2p.shape, lambda b: (0, 0)),
            pl.BlockSpec(bf2p.shape, lambda b: (0, 0)),
            pl.BlockSpec(wf3p.shape, lambda b: (0, 0)),
            pl.BlockSpec(bf3p.shape, lambda b: (0, 0)),
        ],
        out_specs=pl.BlockSpec((1, 1, NF), lambda b: (b, 0, 0)),
        compiler_params=pltpu.CompilerParams(
            dimension_semantics=("parallel",)),
    )(x2, t1, b1e, t2, b2e, wf1p, bf1p, wf2p, bf2p, wf3p, bf3p)

    return out.reshape(B, NF)[:, :n_cls]


# ---------------------------------------------------------------------------
# Parameter init (PyTorch-style uniform) and pure-JAX reference
# ---------------------------------------------------------------------------
def init_params(key, in_features=3):
    ks = jax.random.split(key, 10)

    def uniform(k, shape, fan_in):
        lim = 1.0 / jnp.sqrt(jnp.float32(fan_in))
        return jax.random.uniform(k, shape, jnp.float32, -lim, lim)

    return {
        "conv1_w": uniform(ks[0], (6, in_features, 5, 5), in_features * 25),
        "conv1_b": uniform(ks[1], (6,), in_features * 25),
        "conv2_w": uniform(ks[2], (16, 6, 5, 5), 6 * 25),
        "conv2_b": uniform(ks[3], (16,), 6 * 25),
        "fc1_w": uniform(ks[4], (120, 400), 400),
        "fc1_b": uniform(ks[5], (120,), 400),
        "fc2_w": uniform(ks[6], (84, 120), 120),
        "fc2_b": uniform(ks[7], (84,), 120),
        "fc3_w": uniform(ks[8], (10, 84), 84),
        "fc3_b": uniform(ks[9], (10,), 84),
    }


def _reference_forward(x, params):
    dn = ("NCHW", "OIHW", "NCHW")
    y = jax.lax.conv_general_dilated(x, params["conv1_w"], (1, 1), "VALID",
                                     dimension_numbers=dn)
    y = jnp.tanh(y + params["conv1_b"][None, :, None, None])
    b, c, h, w = y.shape
    y = y.reshape(b, c, h // 2, 2, w // 2, 2).max(axis=(3, 5))
    y = jax.lax.conv_general_dilated(y, params["conv2_w"], (1, 1), "VALID",
                                     dimension_numbers=dn)
    y = jnp.tanh(y + params["conv2_b"][None, :, None, None])
    b, c, h, w = y.shape
    y = y.reshape(b, c, h // 2, 2, w // 2, 2).max(axis=(3, 5))
    y = y.reshape(b, -1)
    y = jnp.tanh(y @ params["fc1_w"].T + params["fc1_b"])
    y = jnp.tanh(y @ params["fc2_w"].T + params["fc2_b"])
    return y @ params["fc3_w"].T + params["fc3_b"]


if __name__ == "__main__":
    key = jax.random.PRNGKey(0)
    k_x, k_p = jax.random.split(key)
    # LeNet5 needs 32x32 spatial input so the flatten yields 16*5*5 = 400.
    x = jax.random.normal(k_x, (2, 3, 32, 32), dtype=jnp.float32)
    params = init_params(k_p, in_features=3)

    fwd = jax.jit(lenet5_forward)
    out = jax.block_until_ready(fwd(x, params))
    assert out.shape == (2, 10) and out.dtype == jnp.float32

    ref = _reference_forward(x, params)
    max_err = float(jnp.max(jnp.abs(out - ref)))
    # bf16 MXU inputs with f32 accumulation; loose-but-bug-catching tolerance.
    assert max_err < 1e-1, f"mismatch vs reference: {max_err}"
    print("KERNEL_OK")
</pallas_src>

<mosaic_0001>
module attributes {stable_mosaic.version = 11 : i64} {
  func.func @kernel(%arg0: i32, %arg1: memref<1x32x96xbf16, #tpu.memory_space<vmem>>, %arg2: memref<96x840xbf16, #tpu.memory_space<vmem>>, %arg3: memref<1x168xf32, #tpu.memory_space<vmem>>, %arg4: memref<84x800xbf16, #tpu.memory_space<vmem>>, %arg5: memref<1x160xf32, #tpu.memory_space<vmem>>, %arg6: memref<400x128xbf16, #tpu.memory_space<vmem>>, %arg7: memref<1x128xf32, #tpu.memory_space<vmem>>, %arg8: memref<128x128xbf16, #tpu.memory_space<vmem>>, %arg9: memref<1x128xf32, #tpu.memory_space<vmem>>, %arg10: memref<128x128xbf16, #tpu.memory_space<vmem>>, %arg11: memref<1x128xf32, #tpu.memory_space<vmem>>, %arg12: memref<1x1x128xf32, #tpu.memory_space<vmem>>) attributes {dimension_semantics = [#tpu.dimension_semantics<parallel>], iteration_bounds = array<i64: 2>, scalar_prefetch = 0 : i64, scratch_operands = 0 : i64, tpu.core_type = #tpu.core_type<tc>, window_params = [{transform_indices = @transform_0, window_bounds = array<i64: 1, 32, 96>}, {pipeline_mode = #tpu.pipeline_mode<synchronous>, transform_indices = @transform_1, window_bounds = array<i64: 96, 840>}, {pipeline_mode = #tpu.pipeline_mode<synchronous>, transform_indices = @transform_2, window_bounds = array<i64: 1, 168>}, {pipeline_mode = #tpu.pipeline_mode<synchronous>, transform_indices = @transform_3, window_bounds = array<i64: 84, 800>}, {pipeline_mode = #tpu.pipeline_mode<synchronous>, transform_indices = @transform_4, window_bounds = array<i64: 1, 160>}, {pipeline_mode = #tpu.pipeline_mode<synchronous>, transform_indices = @transform_5, window_bounds = array<i64: 400, 128>}, {pipeline_mode = #tpu.pipeline_mode<synchronous>, transform_indices = @transform_6, window_bounds = array<i64: 1, 128>}, {pipeline_mode = #tpu.pipeline_mode<synchronous>, transform_indices = @transform_7, window_bounds = array<i64: 128, 128>}, {pipeline_mode = #tpu.pipeline_mode<synchronous>, transform_indices = @transform_8, window_bounds = array<i64: 1, 128>}, {pipeline_mode = #tpu.pipeline_mode<synchronous>, transform_indices = @transform_9, window_bounds = array<i64: 128, 128>}, {pipeline_mode = #tpu.pipeline_mode<synchronous>, transform_indices = @transform_10, window_bounds = array<i64: 1, 128>}, {transform_indices = @transform_11, window_bounds = array<i64: 1, 1, 128>}]} {
    %c0 = arith.constant 0 : index
    %c0_0 = arith.constant 0 : index
    %c0_1 = arith.constant 0 : index
    %0 = vector.load %arg1[%c0, %c0_0, %c0_1] : memref<1x32x96xbf16, #tpu.memory_space<vmem>>, vector<1x32x96xbf16>
    %1 = vector.shape_cast %0 : vector<1x32x96xbf16> to vector<32x96xbf16>
    %c0_2 = arith.constant 0 : index
    %c0_3 = arith.constant 0 : index
    %2 = vector.load %arg2[%c0_2, %c0_3] : memref<96x840xbf16, #tpu.memory_space<vmem>>, vector<96x840xbf16>
    %cst = arith.constant dense<0.000000e+00> : vector<32x840xf32>
    %3 = tpu.matmul %1, %2, %cst {dimension_numbers = #tpu.dot_dimension_numbers<[1], [0], [0], [1], [0, 0, 1, 1], [], []>} : vector<32x96xbf16>, vector<96x840xbf16>, vector<32x840xf32> -> vector<32x840xf32>
    %4 = vector.extract_strided_slice %3 {offsets = [0, 0], sizes = [28, 168], strides = [1, 1]} : vector<32x840xf32> to vector<28x168xf32>
    %5 = vector.extract_strided_slice %3 {offsets = [1, 168], sizes = [28, 168], strides = [1, 1]} : vector<32x840xf32> to vector<28x168xf32>
    %6 = arith.addf %4, %5 : vector<28x168xf32>
    %7 = vector.extract_strided_slice %3 {offsets = [2, 336], sizes = [28, 168], strides = [1, 1]} : vector<32x840xf32> to vector<28x168xf32>
    %8 = arith.addf %6, %7 : vector<28x168xf32>
    %9 = vector.extract_strided_slice %3 {offsets = [3, 504], sizes = [28, 168], strides = [1, 1]} : vector<32x840xf32> to vector<28x168xf32>
    %10 = arith.addf %8, %9 : vector<28x168xf32>
    %11 = vector.extract_strided_slice %3 {offsets = [4, 672], sizes = [28, 168], strides = [1, 1]} : vector<32x840xf32> to vector<28x168xf32>
    %12 = arith.addf %10, %11 : vector<28x168xf32>
    %c0_4 = arith.constant 0 : index
    %c0_5 = arith.constant 0 : index
    %13 = vector.load %arg3[%c0_4, %c0_5] : memref<1x168xf32, #tpu.memory_space<vmem>>, vector<1x168xf32>
    %14 = vector.broadcast %13 : vector<1x168xf32> to vector<28x168xf32>
    %15 = arith.addf %12, %14 : vector<28x168xf32>
    %16 = math.tanh %15 : vector<28x168xf32>
    %17 = vector.extract_strided_slice %16 {offsets = [0, 0], sizes = [28, 84], strides = [1, 1]} : vector<28x168xf32> to vector<28x84xf32>
    %18 = vector.extract_strided_slice %16 {offsets = [0, 84], sizes = [28, 84], strides = [1, 1]} : vector<28x168xf32> to vector<28x84xf32>
    %19 = arith.maximumf %17, %18 : vector<28x84xf32>
    %20 = vector.extract_strided_slice %19 {offsets = [0, 0], sizes = [1, 84], strides = [1, 1]} : vector<28x84xf32> to vector<1x84xf32>
    %21 = vector.extract_strided_slice %19 {offsets = [1, 0], sizes = [1, 84], strides = [1, 1]} : vector<28x84xf32> to vector<1x84xf32>
    %22 = arith.maximumf %20, %21 : vector<1x84xf32>
    %23 = vector.extract_strided_slice %19 {offsets = [2, 0], sizes = [1, 84], strides = [1, 1]} : vector<28x84xf32> to vector<1x84xf32>
    %24 = vector.extract_strided_slice %19 {offsets = [3, 0], sizes = [1, 84], strides = [1, 1]} : vector<28x84xf32> to vector<1x84xf32>
    %25 = arith.maximumf %23, %24 : vector<1x84xf32>
    %26 = vector.extract_strided_slice %19 {offsets = [4, 0], sizes = [1, 84], strides = [1, 1]} : vector<28x84xf32> to vector<1x84xf32>
    %27 = vector.extract_strided_slice %19 {offsets = [5, 0], sizes = [1, 84], strides = [1, 1]} : vector<28x84xf32> to vector<1x84xf32>
    %28 = arith.maximumf %26, %27 : vector<1x84xf32>
    %29 = vector.extract_strided_slice %19 {offsets = [6, 0], sizes = [1, 84], strides = [1, 1]} : vector<28x84xf32> to vector<1x84xf32>
    %30 = vector.extract_strided_slice %19 {offsets = [7, 0], sizes = [1, 84], strides = [1, 1]} : vector<28x84xf32> to vector<1x84xf32>
    %31 = arith.maximumf %29, %30 : vector<1x84xf32>
    %32 = vector.extract_strided_slice %19 {offsets = [8, 0], sizes = [1, 84], strides = [1, 1]} : vector<28x84xf32> to vector<1x84xf32>
    %33 = vector.extract_strided_slice %19 {offsets = [9, 0], sizes = [1, 84], strides = [1, 1]} : vector<28x84xf32> to vector<1x84xf32>
    %34 = arith.maximumf %32, %33 : vector<1x84xf32>
    %35 = vector.extract_strided_slice %19 {offsets = [10, 0], sizes = [1, 84], strides = [1, 1]} : vector<28x84xf32> to vector<1x84xf32>
    %36 = vector.extract_strided_slice %19 {offsets = [11, 0], sizes = [1, 84], strides = [1, 1]} : vector<28x84xf32> to vector<1x84xf32>
    %37 = arith.maximumf %35, %36 : vector<1x84xf32>
    %38 = vector.extract_strided_slice %19 {offsets = [12, 0], sizes = [1, 84], strides = [1, 1]} : vector<28x84xf32> to vector<1x84xf32>
    %39 = vector.extract_strided_slice %19 {offsets = [13, 0], sizes = [1, 84], strides = [1, 1]} : vector<28x84xf32> to vector<1x84xf32>
    %40 = arith.maximumf %38, %39 : vector<1x84xf32>
    %41 = vector.extract_strided_slice %19 {offsets = [14, 0], sizes = [1, 84], strides = [1, 1]} : vector<28x84xf32> to vector<1x84xf32>
    %42 = vector.extract_strided_slice %19 {offsets = [15, 0], sizes = [1, 84], strides = [1, 1]} : vector<28x84xf32> to vector<1x84xf32>
    %43 = arith.maximumf %41, %42 : vector<1x84xf32>
    %44 = vector.extract_strided_slice %19 {offsets = [16, 0], sizes = [1, 84], strides = [1, 1]} : vector<28x84xf32> to vector<1x84xf32>
    %45 = vector.extract_strided_slice %19 {offsets = [17, 0], sizes = [1, 84], strides = [1, 1]} : vector<28x84xf32> to vector<1x84xf32>
    %46 = arith.maximumf %44, %45 : vector<1x84xf32>
    %47 = vector.extract_strided_slice %19 {offsets = [18, 0], sizes = [1, 84], strides = [1, 1]} : vector<28x84xf32> to vector<1x84xf32>
    %48 = vector.extract_strided_slice %19 {offsets = [19, 0], sizes = [1, 84], strides = [1, 1]} : vector<28x84xf32> to vector<1x84xf32>
    %49 = arith.maximumf %47, %48 : vector<1x84xf32>
    %50 = vector.extract_strided_slice %19 {offsets = [20, 0], sizes = [1, 84], strides = [1, 1]} : vector<28x84xf32> to vector<1x84xf32>
    %51 = vector.extract_strided_slice %19 {offsets = [21, 0], sizes = [1, 84], strides = [1, 1]} : vector<28x84xf32> to vector<1x84xf32>
    %52 = arith.maximumf %50, %51 : vector<1x84xf32>
    %53 = vector.extract_strided_slice %19 {offsets = [22, 0], sizes = [1, 84], strides = [1, 1]} : vector<28x84xf32> to vector<1x84xf32>
    %54 = vector.extract_strided_slice %19 {offsets = [23, 0], sizes = [1, 84], strides = [1, 1]} : vector<28x84xf32> to vector<1x84xf32>
    %55 = arith.maximumf %53, %54 : vector<1x84xf32>
    %56 = vector.extract_strided_slice %19 {offsets = [24, 0], sizes = [1, 84], strides = [1, 1]} : vector<28x84xf32> to vector<1x84xf32>
    %57 = vector.extract_strided_slice %19 {offsets = [25, 0], sizes = [1, 84], strides = [1, 1]} : vector<28x84xf32> to vector<1x84xf32>
    %58 = arith.maximumf %56, %57 : vector<1x84xf32>
    %59 = vector.extract_strided_slice %19 {offsets = [26, 0], sizes = [1, 84], strides = [1, 1]} : vector<28x84xf32> to vector<1x84xf32>
    %60 = vector.extract_strided_slice %19 {offsets = [27, 0], sizes = [1, 84], strides = [1, 1]} : vector<28x84xf32> to vector<1x84xf32>
    %61 = arith.maximumf %59, %60 : vector<1x84xf32>
    %62 = tpu.concatenate %22, %25, %28, %31, %34, %37, %40, %43, %46, %49, %52, %55, %58, %61 in 0 : vector<1x84xf32>, vector<1x84xf32>, vector<1x84xf32>, vector<1x84xf32>, vector<1x84xf32>, vector<1x84xf32>, vector<1x84xf32>, vector<1x84xf32>, vector<1x84xf32>, vector<1x84xf32>, vector<1x84xf32>, vector<1x84xf32>, vector<1x84xf32>, vector<1x84xf32> -> vector<14x84xf32>
    %63 = arith.truncf %62 : vector<14x84xf32> to vector<14x84xbf16>
    %c0_6 = arith.constant 0 : index
    %c0_7 = arith.constant 0 : index
    %64 = vector.load %arg4[%c0_6, %c0_7] : memref<84x800xbf16, #tpu.memory_space<vmem>>, vector<84x800xbf16>
    %cst_8 = arith.constant dense<0.000000e+00> : vector<14x800xf32>
    %65 = tpu.matmul %63, %64, %cst_8 {dimension_numbers = #tpu.dot_dimension_numbers<[1], [0], [0], [1], [0, 0, 1, 1], [], []>} : vector<14x84xbf16>, vector<84x800xbf16>, vector<14x800xf32> -> vector<14x800xf32>
    %66 = vector.extract_strided_slice %65 {offsets = [0, 0], sizes = [10, 160], strides = [1, 1]} : vector<14x800xf32> to vector<10x160xf32>
    %67 = vector.extract_strided_slice %65 {offsets = [1, 160], sizes = [10, 160], strides = [1, 1]} : vector<14x800xf32> to vector<10x160xf32>
    %68 = arith.addf %66, %67 : vector<10x160xf32>
    %69 = vector.extract_strided_slice %65 {offsets = [2, 320], sizes = [10, 160], strides = [1, 1]} : vector<14x800xf32> to vector<10x160xf32>
    %70 = arith.addf %68, %69 : vector<10x160xf32>
    %71 = vector.extract_strided_slice %65 {offsets = [3, 480], sizes = [10, 160], strides = [1, 1]} : vector<14x800xf32> to vector<10x160xf32>
    %72 = arith.addf %70, %71 : vector<10x160xf32>
    %73 = vector.extract_strided_slice %65 {offsets = [4, 640], sizes = [10, 160], strides = [1, 1]} : vector<14x800xf32> to vector<10x160xf32>
    %74 = arith.addf %72, %73 : vector<10x160xf32>
    %c0_9 = arith.constant 0 : index
    %c0_10 = arith.constant 0 : index
    %75 = vector.load %arg5[%c0_9, %c0_10] : memref<1x160xf32, #tpu.memory_space<vmem>>, vector<1x160xf32>
    %76 = vector.broadcast %75 : vector<1x160xf32> to vector<10x160xf32>
    %77 = arith.addf %74, %76 : vector<10x160xf32>
    %78 = math.tanh %77 : vector<10x160xf32>
    %79 = vector.extract_strided_slice %78 {offsets = [0, 0], sizes = [10, 80], strides = [1, 1]} : vector<10x160xf32> to vector<10x80xf32>
    %80 = vector.extract_strided_slice %78 {offsets = [0, 80], sizes = [10, 80], strides = [1, 1]} : vector<10x160xf32> to vector<10x80xf32>
    %81 = arith.maximumf %79, %80 : vector<10x80xf32>
    %82 = vector.extract_strided_slice %81 {offsets = [0, 0], sizes = [1, 80], strides = [1, 1]} : vector<10x80xf32> to vector<1x80xf32>
    %83 = vector.extract_strided_slice %81 {offsets = [1, 0], sizes = [1, 80], strides = [1, 1]} : vector<10x80xf32> to vector<1x80xf32>
    %84 = arith.maximumf %82, %83 : vector<1x80xf32>
    %85 = vector.extract_strided_slice %81 {offsets = [2, 0], sizes = [1, 80], strides = [1, 1]} : vector<10x80xf32> to vector<1x80xf32>
    %86 = vector.extract_strided_slice %81 {offsets = [3, 0], sizes = [1, 80], strides = [1, 1]} : vector<10x80xf32> to vector<1x80xf32>
    %87 = arith.maximumf %85, %86 : vector<1x80xf32>
    %88 = vector.extract_strided_slice %81 {offsets = [4, 0], sizes = [1, 80], strides = [1, 1]} : vector<10x80xf32> to vector<1x80xf32>
    %89 = vector.extract_strided_slice %81 {offsets = [5, 0], sizes = [1, 80], strides = [1, 1]} : vector<10x80xf32> to vector<1x80xf32>
    %90 = arith.maximumf %88, %89 : vector<1x80xf32>
    %91 = vector.extract_strided_slice %81 {offsets = [6, 0], sizes = [1, 80], strides = [1, 1]} : vector<10x80xf32> to vector<1x80xf32>
    %92 = vector.extract_strided_slice %81 {offsets = [7, 0], sizes = [1, 80], strides = [1, 1]} : vector<10x80xf32> to vector<1x80xf32>
    %93 = arith.maximumf %91, %92 : vector<1x80xf32>
    %94 = vector.extract_strided_slice %81 {offsets = [8, 0], sizes = [1, 80], strides = [1, 1]} : vector<10x80xf32> to vector<1x80xf32>
    %95 = vector.extract_strided_slice %81 {offsets = [9, 0], sizes = [1, 80], strides = [1, 1]} : vector<10x80xf32> to vector<1x80xf32>
    %96 = arith.maximumf %94, %95 : vector<1x80xf32>
    %97 = tpu.concatenate %84, %87, %90, %93, %96 in 0 : vector<1x80xf32>, vector<1x80xf32>, vector<1x80xf32>, vector<1x80xf32>, vector<1x80xf32> -> vector<5x80xf32>
    %98 = vector.extract_strided_slice %97 {offsets = [0, 0], sizes = [1, 80], strides = [1, 1]} : vector<5x80xf32> to vector<1x80xf32>
    %99 = vector.extract_strided_slice %97 {offsets = [1, 0], sizes = [1, 80], strides = [1, 1]} : vector<5x80xf32> to vector<1x80xf32>
    %100 = vector.extract_strided_slice %97 {offsets = [2, 0], sizes = [1, 80], strides = [1, 1]} : vector<5x80xf32> to vector<1x80xf32>
    %101 = vector.extract_strided_slice %97 {offsets = [3, 0], sizes = [1, 80], strides = [1, 1]} : vector<5x80xf32> to vector<1x80xf32>
    %102 = vector.extract_strided_slice %97 {offsets = [4, 0], sizes = [1, 80], strides = [1, 1]} : vector<5x80xf32> to vector<1x80xf32>
    %103 = tpu.concatenate %98, %99, %100, %101, %102 in 1 : vector<1x80xf32>, vector<1x80xf32>, vector<1x80xf32>, vector<1x80xf32>, vector<1x80xf32> -> vector<1x400xf32>
    %104 = arith.truncf %103 : vector<1x400xf32> to vector<1x400xbf16>
    %c0_11 = arith.constant 0 : index
    %c0_12 = arith.constant 0 : index
    %105 = vector.load %arg6[%c0_11, %c0_12] : memref<400x128xbf16, #tpu.memory_space<vmem>>, vector<400x128xbf16>
    %cst_13 = arith.constant dense<0.000000e+00> : vector<1x128xf32>
    %106 = tpu.matmul %104, %105, %cst_13 {dimension_numbers = #tpu.dot_dimension_numbers<[1], [0], [0], [1], [0, 0, 1, 1], [], []>} : vector<1x400xbf16>, vector<400x128xbf16>, vector<1x128xf32> -> vector<1x128xf32>
    %c0_14 = arith.constant 0 : index
    %c0_15 = arith.constant 0 : index
    %107 = vector.load %arg7[%c0_14, %c0_15] : memref<1x128xf32, #tpu.memory_space<vmem>>, vector<1x128xf32>
    %108 = arith.addf %106, %107 : vector<1x128xf32>
    %109 = math.tanh %108 : vector<1x128xf32>
    %110 = arith.truncf %109 : vector<1x128xf32> to vector<1x128xbf16>
    %c0_16 = arith.constant 0 : index
    %c0_17 = arith.constant 0 : index
    %111 = vector.load %arg8[%c0_16, %c0_17] : memref<128x128xbf16, #tpu.memory_space<vmem>>, vector<128x128xbf16>
    %cst_18 = arith.constant dense<0.000000e+00> : vector<1x128xf32>
    %112 = tpu.matmul %110, %111, %cst_18 {dimension_numbers = #tpu.dot_dimension_numbers<[1], [0], [0], [1], [0, 0, 1, 1], [], []>} : vector<1x128xbf16>, vector<128x128xbf16>, vector<1x128xf32> -> vector<1x128xf32>
    %c0_19 = arith.constant 0 : index
    %c0_20 = arith.constant 0 : index
    %113 = vector.load %arg9[%c0_19, %c0_20] : memref<1x128xf32, #tpu.memory_space<vmem>>, vector<1x128xf32>
    %114 = arith.addf %112, %113 : vector<1x128xf32>
    %115 = math.tanh %114 : vector<1x128xf32>
    %116 = arith.truncf %115 : vector<1x128xf32> to vector<1x128xbf16>
    %c0_21 = arith.constant 0 : index
    %c0_22 = arith.constant 0 : index
    %117 = vector.load %arg10[%c0_21, %c0_22] : memref<128x128xbf16, #tpu.memory_space<vmem>>, vector<128x128xbf16>
    %cst_23 = arith.constant dense<0.000000e+00> : vector<1x128xf32>
    %118 = tpu.matmul %116, %117, %cst_23 {dimension_numbers = #tpu.dot_dimension_numbers<[1], [0], [0], [1], [0, 0, 1, 1], [], []>} : vector<1x128xbf16>, vector<128x128xbf16>, vector<1x128xf32> -> vector<1x128xf32>
    %c0_24 = arith.constant 0 : index
    %c0_25 = arith.constant 0 : index
    %119 = vector.load %arg11[%c0_24, %c0_25] : memref<1x128xf32, #tpu.memory_space<vmem>>, vector<1x128xf32>
    %120 = arith.addf %118, %119 : vector<1x128xf32>
    %c0_26 = arith.constant 0 : index
    %c0_27 = arith.constant 0 : index
    %c0_28 = arith.constant 0 : index
    %121 = vector.load %arg12[%c0_26, %c0_27, %c0_28] : memref<1x1x128xf32, #tpu.memory_space<vmem>>, vector<1x1x128xf32>
    %122 = vector.shape_cast %121 : vector<1x1x128xf32> to vector<1x128xf32>
    %123 = vector.shape_cast %120 : vector<1x128xf32> to vector<1x1x128xf32>
    tpu.vector_store %arg12[%c0_26, %c0_27, %c0_28], %123 {strides = array<i32>} : memref<1x1x128xf32, #tpu.memory_space<vmem>>, vector<1x1x128xf32>,
    return
  }
  func.func @transform_0(%arg0: i32) -> (i32, i32, i32) {
    %c0_i32 = arith.constant 0 : i32
    %c0_i32_0 = arith.constant 0 : i32
    %c0_i32_1 = arith.constant 0 : i32
    return %arg0, %c0_i32, %c0_i32_0 : i32, i32, i32
  }
  func.func @transform_1(%arg0: i32) -> (i32, i32) {
    %c0_i32 = arith.constant 0 : i32
    %c0_i32_0 = arith.constant 0 : i32
    %c0_i32_1 = arith.constant 0 : i32
    return %c0_i32, %c0_i32_0 : i32, i32
  }
  func.func @transform_2(%arg0: i32) -> (i32, i32) {
    %c0_i32 = arith.constant 0 : i32
    %c0_i32_0 = arith.constant 0 : i32
    %c0_i32_1 = arith.constant 0 : i32
    return %c0_i32, %c0_i32_0 : i32, i32
  }
  func.func @transform_3(%arg0: i32) -> (i32, i32) {
    %c0_i32 = arith.constant 0 : i32
    %c0_i32_0 = arith.constant 0 : i32
    %c0_i32_1 = arith.constant 0 : i32
    return %c0_i32, %c0_i32_0 : i32, i32
  }
  func.func @transform_4(%arg0: i32) -> (i32, i32) {
    %c0_i32 = arith.constant 0 : i32
    %c0_i32_0 = arith.constant 0 : i32
    %c0_i32_1 = arith.constant 0 : i32
    return %c0_i32, %c0_i32_0 : i32, i32
  }
  func.func @transform_5(%arg0: i32) -> (i32, i32) {
    %c0_i32 = arith.constant 0 : i32
    %c0_i32_0 = arith.constant 0 : i32
    %c0_i32_1 = arith.constant 0 : i32
    return %c0_i32, %c0_i32_0 : i32, i32
  }
  func.func @transform_6(%arg0: i32) -> (i32, i32) {
    %c0_i32 = arith.constant 0 : i32
    %c0_i32_0 = arith.constant 0 : i32
    %c0_i32_1 = arith.constant 0 : i32
    return %c0_i32, %c0_i32_0 : i32, i32
  }
  func.func @transform_7(%arg0: i32) -> (i32, i32) {
    %c0_i32 = arith.constant 0 : i32
    %c0_i32_0 = arith.constant 0 : i32
    %c0_i32_1 = arith.constant 0 : i32
    return %c0_i32, %c0_i32_0 : i32, i32
  }
  func.func @transform_8(%arg0: i32) -> (i32, i32) {
    %c0_i32 = arith.constant 0 : i32
    %c0_i32_0 = arith.constant 0 : i32
    %c0_i32_1 = arith.constant 0 : i32
    return %c0_i32, %c0_i32_0 : i32, i32
  }
  func.func @transform_9(%arg0: i32) -> (i32, i32) {
    %c0_i32 = arith.constant 0 : i32
    %c0_i32_0 = arith.constant 0 : i32
    %c0_i32_1 = arith.constant 0 : i32
    return %c0_i32, %c0_i32_0 : i32, i32
  }
  func.func @transform_10(%arg0: i32) -> (i32, i32) {
    %c0_i32 = arith.constant 0 : i32
    %c0_i32_0 = arith.constant 0 : i32
    %c0_i32_1 = arith.constant 0 : i32
    return %c0_i32, %c0_i32_0 : i32, i32
  }
  func.func @transform_11(%arg0: i32) -> (i32, i32, i32) {
    %c0_i32 = arith.constant 0 : i32
    %c0_i32_0 = arith.constant 0 : i32
    %c0_i32_1 = arith.constant 0 : i32
    return %arg0, %c0_i32, %c0_i32_0 : i32, i32, i32
  }
}

</mosaic_0001>

<bundles_post_ra>
// kernel: tile.13
= control target key start
LH: loop header
LB: loop body
LE: loop exit
PB: predicated region body
PF: predicated region fallthrough
CT: control target
= control target key end

     0   :  { %s40_s0 = inlined_call_operand.vmem [shape: f32[6], index: 0, kind: input, shape index: {}]   ;;  %s41_s1 = inlined_call_operand.vmem [shape: f32[28,6], index: 1, kind: output, shape index: {}]  }
   0x1   :  { %v4_v0 = vld [vmem:[%s40_s0] ss:$0 sm:$0xff] }
   0x2   :  { %5 = vst [vmem:[%s41_s1] sm:$0xff] %v4_v0  ;;  %12 = vst [vmem:[%s41_s1 + $0x8] sm:$0xff] %v4_v0 }
   0x3   :  { %13 = vst [vmem:[%s41_s1 + $0x10] sm:$0xff] %v4_v0  ;;  %14 = vst [vmem:[%s41_s1 + $0x18] sm:$0xff] %v4_v0 }

// kernel: tile.14
= control target key start
LH: loop header
LB: loop body
LE: loop exit
PB: predicated region body
PF: predicated region fallthrough
CT: control target
= control target key end

     0   :  { %vm9_vm0 = vcmask 15360   ;;  %s247_s12 = smov 126   ;;  %s248_s13 = smov 114   ;;  %vm3_vm1 = vcmask 48128   ;;  %vm13_vm2 = vcmask 31744   ;;  %vm16_vm3 = vcmask 1048560   ;;  %s377_s0 = inlined_call_operand.vmem [shape: f32[28,6], index: 0, kind: input, shape index: {}]   ;;  %s378_s1 = inlined_call_operand.vmem [shape: f32[1,168], index: 1, kind: output, shape index: {}]  }
   0x1   :  { %v191_v0 = vld [vmem:[%s377_s0 + $0x15] sm:$0x1]   ;;  %v194_v3 = vld [vmem:[%s377_s0 + $0x13] sm:$0x1]   ;;  %v193_v4 = vld [vmem:[%s377_s0 + $0x14] sm:$0x1]  }
   0x2   :  { %v192_v1 = vld [vmem:[%s377_s0 + $0x15] sm:$0x1]   ;;  %26 = vrot.lane.b32.xlu1 %v194_v3, %s248_s13  ;;  %v195_v5 = vld [vmem:[%s377_s0 + $0x12] sm:$0x1]   ;;  %s249_s18 = smov 120   ;;  %s250_s19 = smov 108  }
   0x3   :  { %v10_v2 = vsel %vm9_vm0, %v192_v1, %v191_v0  ;;  %v196_v6 = vld [vmem:[%s377_s0 + $0x11] sm:$0x1]   ;;  %v197_v7 = vld [vmem:[%s377_s0 + $0x10] sm:$0x1]   ;;  %s251_s24 = smov 102   ;;  %s252_s25 = smov 96  }
   0x4   :  { %11 = vrot.lane.b32.xlu0 %v10_v2, %s247_s12  ;;  %v198_v8 = vld [vmem:[%s377_s0 + $0xf] sm:$0x1]   ;;  %v199_v9 = vld [vmem:[%s377_s0 + $0xe] sm:$0x1]   ;;  %s253_s30 = smov 90   ;;  %s254_s2 = smov 84  }
   0x5   :  { %v2_v10 = vld [vmem:[%s377_s0] sm:$0x1]   ;;  %v200_v11 = vld [vmem:[%s377_s0 + $0xd] sm:$0x1]   ;;  %v201_v12 = vld [vmem:[%s377_s0 + $0xc] sm:$0x1]  }
   0x6   :  { %32 = vrot.lane.b32.xlu1 %v195_v5, %s250_s19  ;;  %4 = vst.msk [vmem:[#allocation0] sm:$0x1] %vm3_vm1, %v2_v10   ;;  %s255_s9 = smov 78   ;;  %s256_s10 = smov 72   ;;  %v202_v13 = vld [vmem:[%s377_s0 + $0xb] sm:$0x1]  }
   0x7   :  { %v203_v14 = vld [vmem:[%s377_s0 + $0xa] sm:$0x1]   ;;  %s257_s15 = smov 66   ;;  %s258_s16 = smov 60   ;;  %v204_v15 = vld [vmem:[%s377_s0 + $0x9] sm:$0x1]  }
   0x8   :  { %20 = vrot.lane.b32.xlu0 %v193_v4, %s249_s18  ;;  %v205_v16 = vld [vmem:[%s377_s0 + $0x8] sm:$0x1]   ;;  %s259_s21 = smov 54   ;;  %s260_s22 = smov 48   ;;  %v206_v17 = vld [vmem:[%s377_s0 + $0x7] sm:$0x1]  }
   0x9   :  { %v207_v18 = vld [vmem:[%s377_s0 + $0x6] sm:$0x1]   ;;  %s261_s27 = smov 42   ;;  %s262_s28 = smov 36   ;;  %v208_v19 = vld [vmem:[%s377_s0 + $0x1b] sm:$0x1]  }
   0xa   :  { %44 = vrot.lane.b32.xlu1 %v197_v7, %s252_s25  ;;  %v209_v20 = vld [vmem:[%s377_s0 + $0x5] sm:$0x1]   ;;  %s263_s4 = smov 34   ;;  %s264_s5 = smov 30   ;;  %v210_v21 = vld [vmem:[%s377_s0 + $0x1a] sm:$0x1]  }
   0xb   :  { %v211_v22 = vld [vmem:[%s377_s0 + $0x4] sm:$0x1]   ;;  %s266_s11 = smov 24   ;;  %v212_v23 = vld [vmem:[%s377_s0 + $0x19] sm:$0x1]   ;;  %s268_s17 = smov 18  }
   0xc   :  { %38 = vrot.lane.b32.xlu0 %v196_v6, %s251_s24  ;;  %v213_v24 = vld [vmem:[%s377_s0 + $0x3] sm:$0x1]   ;;  %v214_v25 = vld [vmem:[%s377_s0 + $0x18] sm:$0x1]   ;;  %v215_v26 = vld [vmem:[%s377_s0 + $0x2] sm:$0x1]  }
   0xd   :  { %s270_s23 = smov 12   ;;  %v216_v27 = vld [vmem:[%s377_s0 + $0x17] sm:$0x1]   ;;  %v217_v28 = vld [vmem:[%s377_s0 + $0x1] sm:$0x1]   ;;  %s272_s29 = smov 6  }
   0xe   :  { %56 = vrot.lane.b32.xlu1 %v199_v9, %s254_s2  ;;  %v218_v29 = vld [vmem:[%s377_s0 + $0x16] sm:$0x1]   ;;  %s273_s0 = smov 4   ;;  %vm22_vm4 = vcmask 1032128   ;;  %vm28_vm5 = vcmask 982928   ;;  %vm34_vm6 = vcmask 933728  }
   0xf   :  { %vm40_vm7 = vcmask 884528   ;;  %vm46_vm8 = vcmask 835328   ;;  %vm52_vm9 = vcmask 786128   ;;  %vm58_vm10 = vcmask 736928  }
  0x10   :  { %50 = vrot.lane.b32.xlu0 %v198_v8, %s253_s30  ;;  %vm64_vm11 = vcmask 687728   ;;  %vm70_vm12 = vcmask 638528   ;;  %vm76_vm13 = vcmask 589328   ;;  %vm82_vm14 = vcmask 540128  }
  0x11   :  { %vm88_vm15 = vcmask 490928   ;;  %vm94_vm0 = vcmask 441728   ;;  %vm100_vm1 = vcmask 392528  }
  0x12   :  { %68 = vrot.lane.b32.xlu1 %v201_v12, %s256_s10  ;;  %s265_s10 = smov 28  }
  0x14   :  { %62 = vrot.lane.b32.xlu0 %v200_v11, %s255_s9 }
  0x16   :  { %80 = vrot.lane.b32.xlu1 %v203_v14, %s258_s16  ;;  %s267_s16 = smov 22  }
  0x18   :  { %74 = vrot.lane.b32.xlu0 %v202_v13, %s257_s15 }
  0x1a   :  { %92 = vrot.lane.b32.xlu1 %v205_v16, %s260_s22  ;;  %s269_s22 = smov 16  }
  0x1c   :  { %86 = vrot.lane.b32.xlu0 %v204_v15, %s259_s21 }
  0x1e   :  { %104 = vrot.lane.b32.xlu1 %v207_v18, %s262_s28  ;;  %s271_s28 = smov 10  }
  0x20   :  { %98 = vrot.lane.b32.xlu0 %v206_v17, %s261_s27 }
  0x22   :  { %117 = vrot.lane.b32.xlu1 %v209_v20, %s264_s5 }
  0x24   :  { %110 = vrot.lane.b32.xlu0 %v208_v19, %s263_s4 }
  0x26   :  { %130 = vrot.lane.b32.xlu1 %v211_v22, %s266_s11 }
  0x28   :  { %123 = vrot.lane.b32.xlu0 %v210_v21, %s265_s10 }
  0x2a   :  { %143 = vrot.lane.b32.xlu1 %v213_v24, %s268_s17 }
  0x2c   :  { %136 = vrot.lane.b32.xlu0 %v212_v23, %s267_s16 }
  0x2e   :  { %156 = vrot.lane.b32.xlu1 %v215_v26, %s270_s23 }
  0x30   :  { %149 = vrot.lane.b32.xlu0 %v214_v25, %s269_s22 }
  0x32   :  { %169 = vrot.lane.b32.xlu1 %v217_v28, %s272_s29 }
  0x34   :  { %162 = vrot.lane.b32.xlu0 %v216_v27, %s271_s28 }
  0x38   :  { %175 = vrot.lane.b32.xlu0 %v218_v29, %s273_s0 }
  0x74   :  { %v27_v31 = vpop.permute.xlu1 %26  }
  0x76   :  { %v12_v30 = vpop.permute.xlu0 %11  }
  0x77   :  { %15 = vst.msk [vmem:[#allocation0 + $0x8] sm:$0x1] %vm13_vm2, %v12_v30   ;;  %vm106_vm2 = vcmask 343328  }
  0x78   :  { %17 = vst.msk [vmem:[#allocation0] sm:$0x1] %vm16_vm3, %v12_v30   ;;  %v33_v33 = vpop.permute.xlu1 %32   ;;  %vm112_vm3 = vcmask 326928  }
  0x7a   :  { %v21_v32 = vpop.permute.xlu0 %20  }
  0x7b   :  { %23 = vst.msk [vmem:[#allocation0] sm:$0x1] %vm22_vm4, %v21_v32   ;;  %vm119_vm4 = vcmask 294128  }
  0x7c   :  { %29 = vst.msk [vmem:[#allocation0] sm:$0x1] %vm28_vm5, %v27_v31   ;;  %v45_v35 = vpop.permute.xlu1 %44   ;;  %vm125_vm5 = vcmask 277728  }
  0x7d   :  { %35 = vst.msk [vmem:[#allocation0] sm:$0x1] %vm34_vm6, %v33_v33   ;;  %vm132_vm6 = vcmask 244928  }
  0x7e   :  { %v39_v34 = vpop.permute.xlu0 %38  }
  0x7f   :  { %41 = vst.msk [vmem:[#allocation0] sm:$0x1] %vm40_vm7, %v39_v34   ;;  %vm138_vm7 = vcmask 228528  }
  0x80   :  { %47 = vst.msk [vmem:[#allocation0] sm:$0x1] %vm46_vm8, %v45_v35   ;;  %v57_v37 = vpop.permute.xlu1 %56   ;;  %vm145_vm8 = vcmask 195728  }
  0x82   :  { %v51_v36 = vpop.permute.xlu0 %50  }
  0x83   :  { %53 = vst.msk [vmem:[#allocation0] sm:$0x1] %vm52_vm9, %v51_v36   ;;  %vm151_vm9 = vcmask 179328  }
  0x84   :  { %59 = vst.msk [vmem:[#allocation0] sm:$0x1] %vm58_vm10, %v57_v37   ;;  %v69_v39 = vpop.permute.xlu1 %68   ;;  %vm158_vm10 = vcmask 146528  }
  0x86   :  { %v63_v38 = vpop.permute.xlu0 %62  }
  0x87   :  { %65 = vst.msk [vmem:[#allocation0] sm:$0x1] %vm64_vm11, %v63_v38   ;;  %vm164_vm11 = vcmask 130128  }
  0x88   :  { %71 = vst.msk [vmem:[#allocation0] sm:$0x1] %vm70_vm12, %v69_v39   ;;  %v81_v41 = vpop.permute.xlu1 %80   ;;  %vm171_vm12 = vcmask 97328  }
  0x8a   :  { %v75_v40 = vpop.permute.xlu0 %74  }
  0x8b   :  { %77 = vst.msk [vmem:[#allocation0] sm:$0x1] %vm76_vm13, %v75_v40   ;;  %vm177_vm13 = vcmask 80928  }
  0x8c   :  { %83 = vst.msk [vmem:[#allocation0] sm:$0x1] %vm82_vm14, %v81_v41   ;;  %v93_v43 = vpop.permute.xlu1 %92  }
  0x8e   :  { %v87_v42 = vpop.permute.xlu0 %86  }
  0x8f   :  { %89 = vst.msk [vmem:[#allocation0] sm:$0x1] %vm88_vm15, %v87_v42  }
  0x90   :  { %95 = vst.msk [vmem:[#allocation0] sm:$0x1] %vm94_vm0, %v93_v43   ;;  %v105_v45 = vpop.permute.xlu1 %104  }
  0x92   :  { %v99_v44 = vpop.permute.xlu0 %98  }
  0x93   :  { %101 = vst.msk [vmem:[#allocation0] sm:$0x1] %vm100_vm1, %v99_v44  }
  0x94   :  { %107 = vst.msk [vmem:[#allocation0] sm:$0x1] %vm106_vm2, %v105_v45   ;;  %v118_v47 = vpop.permute.xlu1 %117  }
  0x95   :  { %120 = vst.msk [vmem:[#allocation0] sm:$0x1] %vm119_vm4, %v118_v47  }
  0x96   :  { %v111_v46 = vpop.permute.xlu0 %110  }
  0x97   :  { %114 = vst.msk [vmem:[#allocation0 + $0x8] sm:$0x1] %vm112_vm3, %v111_v46  }
  0x98   :  { %v131_v49 = vpop.permute.xlu1 %130  }
  0x99   :  { %133 = vst.msk [vmem:[#allocation0] sm:$0x1] %vm132_vm6, %v131_v49  }
  0x9a   :  { %v124_v48 = vpop.permute.xlu0 %123  }
  0x9b   :  { %127 = vst.msk [vmem:[#allocation0 + $0x8] sm:$0x1] %vm125_vm5, %v124_v48  }
  0x9c   :  { %v144_v51 = vpop.permute.xlu1 %143  }
  0x9d   :  { %146 = vst.msk [vmem:[#allocation0] sm:$0x1] %vm145_vm8, %v144_v51  }
  0x9e   :  { %v137_v50 = vpop.permute.xlu0 %136  }
  0x9f   :  { %140 = vst.msk [vmem:[#allocation0 + $0x8] sm:$0x1] %vm138_vm7, %v137_v50  }
  0xa0   :  { %v157_v53 = vpop.permute.xlu1 %156  }
  0xa1   :  { %159 = vst.msk [vmem:[#allocation0] sm:$0x1] %vm158_vm10, %v157_v53  }
  0xa2   :  { %v150_v52 = vpop.permute.xlu0 %149  }
  0xa3   :  { %153 = vst.msk [vmem:[#allocation0 + $0x8] sm:$0x1] %vm151_vm9, %v150_v52  }
  0xa4   :  { %v170_v55 = vpop.permute.xlu1 %169  }
  0xa5   :  { %172 = vst.msk [vmem:[#allocation0] sm:$0x1] %vm171_vm12, %v170_v55  }
  0xa6   :  { %v163_v54 = vpop.permute.xlu0 %162  }
  0xa7   :  { %166 = vst.msk [vmem:[#allocation0 + $0x8] sm:$0x1] %vm164_vm11, %v163_v54  }
  0xaa   :  { %v176_v56 = vpop.permute.xlu0 %175  }
  0xab   :  { %179 = vst.msk [vmem:[#allocation0 + $0x8] sm:$0x1] %vm177_vm13, %v176_v56  }
  0xac   :  { %v183_v57 = vld [vmem:[#allocation0] sm:$0x1] }
  0xad   :  { %185 = vst [vmem:[%s378_s1] sm:$0x1] %v183_v57 }
  0xb2   :  { %v187_v58 = vld [vmem:[#allocation0 + $0x8] sm:$0x1] }
  0xb3   :  { %219 = vst [vmem:[%s378_s1 + $0x1] sm:$0x1] %v187_v58 }

// kernel: tile.18
= control target key start
LH: loop header
LB: loop body
LE: loop exit
PB: predicated region body
PF: predicated region fallthrough
CT: control target
= control target key end

     0   :  { %s28_s0 = inlined_call_operand.vmem [shape: f32[16], index: 0, kind: input, shape index: {}]   ;;  %s29_s1 = inlined_call_operand.vmem [shape: f32[10,16], index: 1, kind: output, shape index: {}]  }
   0x1   :  { %v4_v0 = vld [vmem:[%s28_s0] ss:$0 sm:$0xff] }
   0x2   :  { %5 = vst [vmem:[%s29_s1] sm:$0xff] %v4_v0  ;;  %8 = vst [vmem:[%s29_s1 + $0x8] sm:$0xff] %v4_v0 }

// kernel: tile.19
= control target key start
LH: loop header
LB: loop body
LE: loop exit
PB: predicated region body
PF: predicated region fallthrough
CT: control target
= control target key end

     0   :  { %s75_s10 = smov 112   ;;  %s76_s11 = smov 80   ;;  %vm4_vm0 = vcmask 130048   ;;  %vm10_vm1 = vcmask 1048448   ;;  %vm16_vm2 = vcmask 917248   ;;  %vm22_vm3 = vcmask 786048   ;;  %s122_s0 = inlined_call_operand.vmem [shape: f32[10,16], index: 0, kind: input, shape index: {}]   ;;  %s123_s1 = inlined_call_operand.vmem [shape: f32[1,160], index: 1, kind: output, shape index: {}]  }
   0x1   :  { %v60_v0 = vld [vmem:[%s122_s0 + $0x7] sm:$0x1]   ;;  %v62_v1 = vld [vmem:[%s122_s0 + $0x5] sm:$0x1]   ;;  %v61_v2 = vld [vmem:[%s122_s0 + $0x6] sm:$0x1]  }
   0x2   :  { %8 = vrot.lane.b32.xlu0 %v60_v0, %s75_s10  ;;  %20 = vrot.lane.b32.xlu1 %v62_v1, %s76_s11  ;;  %v63_v3 = vld [vmem:[%s122_s0 + $0x4] sm:$0x1]   ;;  %s2_s16 = smov 3  ;;  %s77_s17 = smov 96   ;;  %v64_v5 = vld [vmem:[%s122_s0 + $0x3] sm:$0x1]  }
   0x3   :  { %s78_s18 = smov 64   ;;  %v3_v4 = vld [vmem:[%s122_s0] ss:$8 sm:%s2_s16]   ;;  %v65_v6 = vld [vmem:[%s122_s0 + $0x2] sm:$0x1]   ;;  %s43_s25 = smov 3 }
   0x4   :  { %5 = vst.msk [vmem:[#allocation0] ss:$8 sm:$0x3] %vm4_vm0, %v3_v4   ;;  %s79_s26 = smov 48   ;;  %s80_s27 = smov 32   ;;  %vm28_vm4 = vcmask 654848  }
   0x5   :  { %v66_v7 = vld [vmem:[%s122_s0 + $0x1] ss:$8 sm:%s43_s25]   ;;  %s81_s0 = smov 16   ;;  %vm34_vm5 = vcmask 523648   ;;  %vm40_vm6 = vcmask 392448   ;;  %vm47_vm7 = vcmask 261248  }
   0x6   :  { %14 = vrot.lane.b32.xlu0 %v61_v2, %s77_s17  ;;  %26 = vrot.lane.b32.xlu1 %v63_v3, %s78_s18 }
   0xa   :  { %32 = vrot.lane.b32.xlu0 %v64_v5, %s79_s26  ;;  %38 = vrot.lane.b32.xlu1 %v65_v6, %s80_s27 }
   0xe   :  { %45 = vrot.lane.b32.xlu0 %v66_v7, %s81_s0 }
  0x74   :  { %v9_v8 = vpop.permute.xlu0 %8   ;;  %v21_v9 = vpop.permute.xlu1 %20  }
  0x75   :  { %11 = vst.msk [vmem:[#allocation0] sm:$0x1] %vm10_vm1, %v9_v8  }
  0x78   :  { %v15_v10 = vpop.permute.xlu0 %14   ;;  %v27_v11 = vpop.permute.xlu1 %26  }
  0x79   :  { %17 = vst.msk [vmem:[#allocation0] sm:$0x1] %vm16_vm2, %v15_v10  }
  0x7a   :  { %23 = vst.msk [vmem:[#allocation0] sm:$0x1] %vm22_vm3, %v21_v9  }
  0x7b   :  { %29 = vst.msk [vmem:[#allocation0] sm:$0x1] %vm28_vm4, %v27_v11  }
  0x7c   :  { %v33_v12 = vpop.permute.xlu0 %32   ;;  %v39_v13 = vpop.permute.xlu1 %38  }
  0x7d   :  { %35 = vst.msk [vmem:[#allocation0] sm:$0x1] %vm34_vm5, %v33_v12  }
  0x7e   :  { %41 = vst.msk [vmem:[#allocation0] sm:$0x1] %vm40_vm6, %v39_v13  }
  0x80   :  { %v46_v14 = vpop.permute.xlu0 %45  }
  0x81   :  { %48 = vst.msk [vmem:[#allocation0] ss:$8 sm:$0x3] %vm47_vm7, %v46_v14  }
  0x88   :  { %v52_v15 = vld [vmem:[#allocation0] sm:$0x1]  ;;  %v56_v16 = vld [vmem:[#allocation0 + $0x8] sm:$0x1] }
  0x89   :  { %54 = vst [vmem:[%s123_s1] sm:$0x1] %v52_v15  ;;  %67 = vst [vmem:[%s123_s1 + $0x1] sm:$0x1] %v56_v16 }

// kernel: lenet5_forward.1
= control target key start
LH: loop header
LB: loop body
LE: loop exit
PB: predicated region body
PF: predicated region fallthrough
CT: control target
= control target key end

     0   :  { %16 = vsyncpa [#allocation3], 0  ;;  %s3902_s0 = inlined_call_operand.vmem [shape: bf16[2,32,96], index: 0, kind: input, shape index: {}]   ;;  %s3903_s1 = inlined_call_operand.vmem [shape: bf16[96,840], index: 1, kind: input, shape index: {}]   ;;  %s3904_s2 = inlined_call_operand.vmem [shape: f32[1,168], index: 2, kind: input, shape index: {}]   ;;  %s3905_s3 = inlined_call_operand.vmem [shape: bf16[84,800], index: 3, kind: input, shape index: {}]   ;;  %s3906_s4 = inlined_call_operand.vmem [shape: f32[1,160], index: 4, kind: input, shape index: {}]   ;;  %s3907_s5 = inlined_call_operand.vmem [shape: bf16[400,128], index: 5, kind: input, shape index: {}]   ;;  %s3908_s6 = inlined_call_operand.vmem [shape: f32[1,128], index: 6, kind: input, shape index: {}]   ;;  %s3909_s7 = inlined_call_operand.vmem [shape: bf16[128,128], index: 7, kind: input, shape index: {}]   ;;  %s3910_s8 = inlined_call_operand.vmem [shape: f32[1,128], index: 8, kind: input, shape index: {}]   ;;  %s3911_s9 = inlined_call_operand.vmem [shape: bf16[128,128], index: 9, kind: input, shape index: {}]   ;;  %s3912_s10 = inlined_call_operand.vmem [shape: f32[1,128], index: 10, kind: input, shape index: {}]   ;;  %s3913_s11 = inlined_call_operand.hbm [shape: f32[2,1,128], index: 11, kind: output, shape index: {}]  }
   0x1   :  { %18 = vsyncpa [#allocation3 + $0x1], 0  ;;  %s3131_s17 = smov 0   ;;  %s3133_s18 = smov 0  }
   0x2   :  { %s3135_s19 = smov 0   ;;  %s3137_s20 = smov 0  }
   0x3 LB: > { %3915 = sst [smem:[#allocation5_spill]] %s3052_s19  ;;  %s3152_s21 = sadd.s32 4294967295, %s3056_s20   ;;  %s3056_s20 = sphi %s3137_s20, %s3923_s20   ;;  %s3052_s19 = sphi %s3135_s19, %s3920_s19   ;;  %s3048_s18 = sphi %s3133_s18, %s3922_s18   ;;  %s3044_s17 = sphi %s3131_s17, %s3921_s17  }
   0x4   : > { %s2445_s22 = sadd.s32 4294967294, %s3056_s20   ;;  %s3156_s23 = sadd.s32 1, %s3056_s20  }
   0x5   : > { %s267_s24 = sadd.s32 1, %s3052_s19  ;;  %s264_s25 = ssub.s32 %s3056_s20, %s3156_s23 }
   0x6   : > { %p277_p0 = scmp.ne.s32.totalorder %s3052_s19, %s3048_s18  ;;  %p265_p1 = scmp.eq.s32.totalorder %s264_s25, 0 }
   0x7   : > { %p278_p2 = scmp.eq.s32.totalorder %s3152_s21, 1  ;;  %p283_p3 = scmp.ne.s32.totalorder %s3048_s18, %s3044_s17 }
   0x8   : > { %p284_p4 = scmp.eq.s32.totalorder %s2445_s22, 1  ;;  %p2448_p7 = scmp.ge.s32.totalorder %s3056_s20, 1 }
   0x9   : > { %s3167_s26 = scalar_select %p265_p1, %s3052_s19, %s267_s24  }
   0xa   : > { %p3169_p5 = por %p278_p2, %p277_p0  ;;  %p3173_p6 = por %p284_p4, %p283_p3 }
   0xb   : > { %3916 = sst [smem:[#allocation6_spill]] %s3167_s26  ;;  %p340_p8 = scmp.lt.s32.totalorder %s3056_s20, 3 }
   0xd   : > { %p341_p9 = pnand %p2448_p7, %p340_p8 }
   0xe   : > { %v2806_v0 = vld [vmem:[%s3903_s1 + $0x4] ss:$28 sps:$4 sm:$0xff] (!%p341_p9)   ;;  %v2808_v1 = vld [vmem:[%s3903_s1 + $0xc] ss:$28 sps:$4 sm:$0xff] (!%p341_p9)   ;;  %v3058_v2 = vmov (!%p341_p9), 0   ;;  %p379_p10 = scmp.lt.s32.totalorder (!%p341_p9), %s3152_s21, 1 }
   0xf   : > { %344 = sbr.rel (%p341_p9) target bundleno = 1909 (0x775), region = 64  ;;  %702 = vmatprep.mubr.bf16.mxu0 (!%p341_p9), %v3058_v2  ;;  %755 = vmatprep.mubr.bf16.mxu1 (!%p341_p9), %v3058_v2  ;;  %v2810_v3 = vld [vmem:[%s3903_s1] ss:$28 sps:$4 sm:$0xff] (!%p341_p9)   ;;  %v2811_v4 = vld [vmem:[%s3903_s1 + $0x8] ss:$28 sps:$4 sm:$0xff] (!%p341_p9)   ;;  %vm663_vm0 = vcmask (!%p341_p9), 785408  }
  0x10   : > { %670 = vmatprep.subr.bf16.mxu0 (!%p341_p9), %v2806_v0  ;;  %723 = vmatprep.subr.bf16.mxu1 (!%p341_p9), %v2808_v1  ;;  %v2812_v5 = vld [vmem:[%s3903_s1 + $0x3c] ss:$28 sps:$4 sm:$0xff] (!%p341_p9)   ;;  %v2814_v6 = vld [vmem:[%s3903_s1 + $0x44] ss:$28 sps:$4 sm:$0xff] (!%p341_p9)   ;;  %v2818_v9 = vld [vmem:[%s3903_s1 + $0x74] ss:$28 sps:$4 sm:$0xff] (!%p341_p9)  }
  0x11   : > { %671 = vmatpush1.bf16.msra.mxu0 (!%p341_p9), %v2810_v3  ;;  %724 = vmatpush1.bf16.msra.mxu1 (!%p341_p9), %v2811_v4  ;;  %v2816_v7 = vld [vmem:[%s3903_s1 + $0x38] ss:$28 sps:$4 sm:$0xff] (!%p341_p9)   ;;  %v2817_v8 = vld [vmem:[%s3903_s1 + $0x40] ss:$28 sps:$4 sm:$0xff] (!%p341_p9)   ;;  %v2822_v11 = vld [vmem:[%s3903_s1 + $0x70] ss:$28 sps:$4 sm:$0xff] (!%p341_p9)  }
  0x12   : > { %672 = vmatprep.subr.bf16.mxu0 (!%p341_p9), %v2812_v5  ;;  %725 = vmatprep.subr.bf16.mxu1 (!%p341_p9), %v2814_v6  ;;  %v2820_v10 = vld [vmem:[%s3903_s1 + $0x7c] ss:$28 sps:$4 sm:$0xff] (!%p341_p9)   ;;  %v2824_v13 = vld [vmem:[%s3903_s1 + $0xac] ss:$28 sps:$4 sm:$0xff] (!%p341_p9)   ;;  %v2826_v14 = vld [vmem:[%s3903_s1 + $0xb4] ss:$28 sps:$4 sm:$0xff] (!%p341_p9)  }
  0x13   : > { %v2823_v12 = vld [vmem:[%s3903_s1 + $0x78] ss:$28 sps:$4 sm:$0xff] (!%p341_p9)   ;;  %v2828_v15 = vld [vmem:[%s3903_s1 + $0xa8] ss:$28 sps:$4 sm:$0xff] (!%p341_p9)   ;;  %v2829_v16 = vld [vmem:[%s3903_s1 + $0xb0] ss:$28 sps:$4 sm:$0xff] (!%p341_p9)  }
  0x14   : > { %v2830_v17 = vld [vmem:[%s3903_s1 + $0xe4] ss:$28 sps:$4 sm:$0xff] (!%p341_p9)   ;;  %v2832_v18 = vld [vmem:[%s3903_s1 + $0xec] ss:$28 sps:$4 sm:$0xff] (!%p341_p9)   ;;  %v2836_v21 = vld [vmem:[%s3903_s1 + $0x11c] ss:$28 sps:$4 sm:$0xff] (!%p341_p9)  }
  0x15   : > { %673 = vmatpush1.bf16.msra.mxu0 (!%p341_p9), %v2816_v7  ;;  %726 = vmatpush1.bf16.msra.mxu1 (!%p341_p9), %v2817_v8  ;;  %v2834_v19 = vld [vmem:[%s3903_s1 + $0xe0] ss:$28 sps:$4 sm:$0xff] (!%p341_p9)   ;;  %v2835_v20 = vld [vmem:[%s3903_s1 + $0xe8] ss:$28 sps:$4 sm:$0xff] (!%p341_p9)   ;;  %v2840_v23 = vld [vmem:[%s3903_s1 + $0x118] ss:$28 sps:$4 sm:$0xff] (!%p341_p9)  }
  0x16   : > { %s380_s16 = scalar_select %p379_p10, %s3152_s21, 1  ;;  %674 = vmatprep.subr.bf16.mxu0 %v2818_v9  ;;  %727 = vmatprep.subr.bf16.mxu1 %v2820_v10  ;;  %v2838_v22 = vld [vmem:[%s3903_s1 + $0x124] ss:$28 sps:$4 sm:$0xff]   ;;  %v2846_v25 = vld [vmem:[%s3903_s1 + $0x14] ss:$28 sps:$4 sm:$0xff]   ;;  %vm886_vm1 = vcmask 1046528  }
  0x17   : > { %v2841_v24 = vld [vmem:[%s3903_s1 + $0x120] ss:$28 sps:$4 sm:$0xff]   ;;  %v2850_v26 = vld [vmem:[%s3903_s1 + $0x18] ss:$28 sps:$4 sm:$0xff]   ;;  %v2844_v28 = vld [vmem:[%s3903_s1 + $0x10] ss:$28 sps:$4 sm:$0xff]  }
  0x18   : > { %s2597_s15 = sshll.u32 %s380_s16, 4  ;;  %v2849_v29 = vld [vmem:[%s3903_s1 + $0x4c] ss:$28 sps:$4 sm:$0xff]   ;;  %v2853_v33 = vld [vmem:[%s3903_s1 + $0x84] ss:$28 sps:$4 sm:$0xff]   ;;  %vm942_vm2 = vcmask 1045504  }
  0x19   : > { %675 = vmatpush1.bf16.msra.mxu0 %v2822_v11  ;;  %728 = vmatpush1.bf16.msra.mxu1 %v2823_v12  ;;  %s383_s13 = scalar_lea.vmem %s3902_s0, %s2597_s15  ;;  %v2854_v30 = vld [vmem:[%s3903_s1 + $0x50] ss:$28 sps:$4 sm:$0xff]   ;;  %v2847_v32 = vld [vmem:[%s3903_s1 + $0x48] ss:$28 sps:$4 sm:$0xff]   ;;  %v2851_v35 = vld [vmem:[%s3903_s1 + $0x80] ss:$28 sps:$4 sm:$0xff]  }
  0x1a   : > { %676 = vmatprep.subr.bf16.mxu0 %v2824_v13  ;;  %729 = vmatprep.subr.bf16.mxu1 %v2826_v14  ;;  %v2842_v27 = vld [vmem:[%s383_s13] sm:$0xff]   ;;  %v2843_v31 = vld [vmem:[%s383_s13 + $0x8] sm:$0xff]   ;;  %v2857_v36 = vld [vmem:[%s3903_s1 + $0xbc] ss:$28 sps:$4 sm:$0xff]   ;;  %vm1002_vm3 = vcmask 1044480   ;;  %s3059_s30 = smov 88  }
  0x1b   : > { %v2858_v34 = vld [vmem:[%s3903_s1 + $0x88] ss:$28 sps:$4 sm:$0xff]   ;;  %v2862_v37 = vld [vmem:[%s3903_s1 + $0xc0] ss:$28 sps:$4 sm:$0xff]   ;;  %v2855_v38 = vld [vmem:[%s3903_s1 + $0xb8] ss:$28 sps:$4 sm:$0xff]  }
  0x1c   : > { %v2861_v39 = vld [vmem:[%s3903_s1 + $0xf4] ss:$28 sps:$4 sm:$0xff]   ;;  %v2865_v42 = vld [vmem:[%s3903_s1 + $0x12c] ss:$28 sps:$4 sm:$0xff]   ;;  %s3060_s12 = smov 48   ;;  %s3061_s16 = smov 8  }
  0x1d   : > { %677 = vmatpush1.bf16.msra.mxu0 %v2828_v15  ;;  %730 = vmatpush1.bf16.msra.mxu1 %v2829_v16  ;;  %v2866_v40 = vld [vmem:[%s3903_s1 + $0xf8] ss:$28 sps:$4 sm:$0xff]   ;;  %v2859_v41 = vld [vmem:[%s3903_s1 + $0xf0] ss:$28 sps:$4 sm:$0xff]   ;;  %v2863_v44 = vld [vmem:[%s3903_s1 + $0x128] ss:$28 sps:$4 sm:$0xff]  }
  0x1e   : > { %678 = vmatprep.subr.bf16.mxu0 %v2830_v17  ;;  %731 = vmatprep.subr.bf16.mxu1 %v2832_v18  ;;  %v2867_v43 = vld [vmem:[%s3903_s1 + $0x130] ss:$28 sps:$4 sm:$0xff]   ;;  %vm1077_vm4 = vcmask 1043456   ;;  %s3062_s14 = smov 96   ;;  %vm917_vm5 = vcmask 719872   ;;  %vm973_vm6 = vcmask 392192  }
  0x1f   : > { %vm1048_vm7 = vcmask 64512   ;;  %s3063_s26 = smov 44   ;;  %vm1239_vm8 = vcmask 1041408   ;;  %vm1180_vm9 = vcmask 359424   ;;  %vm1237_vm10 = vcmask 1040384   ;;  %s3066_s25 = smov 64  }
  0x20   : > { %vm1241_vm11 = vcmask 1042432   ;;  %vm1495_vm12 = vcmask 687104   ;;  %vm3065_vm13 = vmmov 0   ;;  %s3067_s19 = smov 32   ;;  %vm1734_vm14 = vcmask 523264   ;;  %s3068_s29 = smov 80  }
  0x21   : > { %679 = vmatpush1.bf16.msra.mxu0 %v2834_v19  ;;  %732 = vmatpush1.bf16.msra.mxu1 %v2835_v20  ;;  %vm1761_vm15 = vcmask 261120   ;;  %s2594_s22 = sshll.u32 %s3152_s21, 4 }
  0x22   : > { %680 = vmatprep.subr.bf16.mxu0 %v2836_v21  ;;  %733 = vmatprep.subr.bf16.mxu1 %v2838_v22  ;;  %s3860_s15 = scalar_lea.hbm %s3913_s11, %s2594_s22 }
  0x25   : > { %681 = vmatpush1.bf16.msra.mxu0 %v2840_v23  ;;  %734 = vmatpush1.bf16.msra.mxu1 %v2841_v24 }
  0x26   : > { %776 = vmatprep.subr.bf16.mxu0 %v2846_v25  ;;  %2653 = vmatprep.subr.bf16.mxu1 %v2850_v26 }
  0x28   : > { %2495 = vmatmul.mubr.msk.bf16.vlgmr.msra.gmra.mrb[0].mxu0 %vm663_vm0, %v2842_v27  ;;  %2497 = vmatmul.mubr.msk.bf16.vlgmr.msra.gmra.mrb[0].mxu1 %vm663_vm0, %v2842_v27 }
  0x29   : > { %712 = vmatprep.mubr.bf16.mxu0 %v3058_v2  ;;  %765 = vmatprep.mubr.bf16.mxu1 %v3058_v2 }
  0x2a   : > { %777 = vmatpush1.bf16.msra.mxu0 %v2844_v28  ;;  %2654 = vmatpush3.bf16.msra.mxu1 %v2850_v26 }
  0x2b   : > { %778 = vmatprep.subr.bf16.mxu0 %v2849_v29  ;;  %2655 = vmatprep.subr.bf16.mxu1 %v2854_v30 }
  0x2e   : > { %779 = vmatpush1.bf16.msra.mxu0 %v2847_v32  ;;  %2656 = vmatpush3.bf16.msra.mxu1 %v2854_v30 }
  0x2f   : > { %780 = vmatprep.subr.bf16.mxu0 %v2853_v33  ;;  %2657 = vmatprep.subr.bf16.mxu1 %v2858_v34 }
  0x30   : > { %2496 = vmatmul.mubr.msk.bf16.gmra.mrb[4].mxu0 %vm663_vm0, %v2843_v31  ;;  %2498 = vmatmul.mubr.msk.bf16.gmra.mrb[4].mxu1 %vm663_vm0, %v2843_v31 }
  0x31   : > { %808 = vmatprep.mubr.bf16.mxu0 %v3058_v2  ;;  %2665 = vmatprep.mubr.msk.bf16.mxu1 %vm663_vm0, %v2842_v27 }
  0x32   : > { %781 = vmatpush1.bf16.msra.mxu0 %v2851_v35  ;;  %2658 = vmatpush3.bf16.msra.mxu1 %v2858_v34 }
  0x33   : > { %782 = vmatprep.subr.bf16.mxu0 %v2857_v36  ;;  %2659 = vmatprep.subr.bf16.mxu1 %v2862_v37 }
  0x36   : > { %783 = vmatpush1.bf16.msra.mxu0 %v2855_v38  ;;  %2660 = vmatpush3.bf16.msra.mxu1 %v2862_v37 }
  0x37   : > { %784 = vmatprep.subr.bf16.mxu0 %v2861_v39  ;;  %2661 = vmatprep.subr.bf16.mxu1 %v2866_v40 }
  0x3a   : > { %785 = vmatpush1.bf16.msra.mxu0 %v2859_v41  ;;  %2662 = vmatpush3.bf16.msra.mxu1 %v2866_v40 }
  0x3b   : > { %786 = vmatprep.subr.bf16.mxu0 %v2865_v42  ;;  %2663 = vmatprep.subr.bf16.mxu1 %v2867_v43 }
  0x3e   : > { %787 = vmatpush1.bf16.msra.mxu0 %v2863_v44  ;;  %2664 = vmatpush3.bf16.msra.mxu1 %v2867_v43 }
  0x41   : > { %2499 = vmatmul.mubr.msk.bf16.vlgmr.msra.gmra.mrb[8].mxu0 %vm663_vm0, %v2842_v27  ;;  %2666 = vmatmul.mubr.msk.bf16.vlgmr.msra.gmra.mrb[8].mxu1 %vm663_vm0, %v2843_v31 }
  0x42   : > { %818 = vmatprep.mubr.bf16.mxu0 %v3058_v2  ;;  %1595 = vmatprep.mubr.bf16.mxu1 %v3058_v2 }
  0x49   : > { %2500 = vmatmul.mubr.msk.bf16.gmra.mrb[12].mxu0 %vm663_vm0, %v2843_v31 }
  0x4a   : > { %1552 = vmatprep.mubr.bf16.mxu0 %v3058_v2 }
  0xfb   : > { %v757_v45 = vpop.f32.mrb[0].mxu1  ;;  %v3326_v46 = vpop.f32.mrb[0].mxu0 }
  0xfc   : > { %v759_v47 = vpop.f32.mrb[1].mxu1  ;;  %v3328_v48 = vpop.f32.mrb[1].mxu0  ;;  %v890_v49 = vrot.slane %v757_v45, 1  ;;  %v943_v53 = vrot.slane %v757_v45, 2 }
  0xfd   : > { %v761_v50 = vpop.f32.mrb[2].mxu1  ;;  %v887_v51 = vrot.slane %v3328_v48, 1  ;;  %v3331_v52 = vpop.f32.mrb[2].mxu0  ;;  %v946_v54 = vrot.slane %v759_v47, 2  ;;  %v1003_v59 = vrot.slane %v759_v47, 3 }
  0xfe   : > { %v891_v55 = vrot.slane %v761_v50, 1  ;;  %v944_v56 = vrot.slane %v761_v50, 2  ;;  %v763_v57 = vpop.f32.mrb[3].mxu1  ;;  %v3333_v58 = vpop.f32.mrb[3].mxu0 }
  0xff   : > { %v947_v60 = vrot.slane %v763_v57, 2  ;;  %v1004_v61 = vrot.slane %v763_v57, 3  ;;  %v888_v62 = vrot.slane %v3333_v58, 1 }
 0x100   : > { %v892_v63 = vsel %vm886_vm1, %v890_v49, %v891_v55  ;;  %v945_v0 = vsel %vm942_vm2, %v943_v53, %v944_v56 }
 0x101   : > { %903 = vrot.lane.b32.xlu0 %v892_v63, %s3059_s30  ;;  %v948_v1 = vsel %vm942_vm2, %v946_v54, %v947_v60  ;;  %v889_v3 = vsel %vm886_vm1, %v887_v51, %v888_v62  ;;  %v1005_v4 = vsel %vm1002_vm3, %v1003_v59, %v1004_v61 }
 0x102   : > { %959 = vrot.lane.b32.xlu1 %v948_v1, %s3060_s12 }
 0x103   : > { %v3343_v5 = vpop.f32.mrb[4].mxu0  ;;  %v767_v6 = vpop.f32.mrb[4].mxu1 }
 0x104   : > { %v895_v7 = vrot.slane %v767_v6, 1  ;;  %v949_v8 = vrot.slane %v767_v6, 2  ;;  %v3345_v9 = vpop.f32.mrb[5].mxu0  ;;  %v769_v10 = vpop.f32.mrb[5].mxu1 }
 0x105   : > { %v893_v11 = vrot.slane %v3345_v9, 1  ;;  %v951_v12 = vrot.slane %v769_v10, 2  ;;  %v1012_v13 = vrot.slane %v769_v10, 3  ;;  %957 = vrot.lane.b32.xlu0 %v945_v0, %s3060_s12  ;;  %v771_v14 = vpop.f32.mrb[6].mxu1  ;;  %v3349_v15 = vpop.f32.mrb[6].mxu0 }
 0x106   : > { %v899_v16 = vrot.slane %v771_v14, 1  ;;  %v953_v17 = vrot.slane %v771_v14, 2  ;;  %v773_v18 = vpop.f32.mrb[7].mxu1  ;;  %v896_v19 = vsel %vm886_vm1, %v891_v55, %v895_v7  ;;  %v950_v20 = vsel %vm942_vm2, %v944_v56, %v949_v8  ;;  %v3353_v21 = vpop.f32.mrb[7].mxu0 }
 0x107   : > { %v955_v22 = vrot.slane %v773_v18, 2  ;;  %v1018_v23 = vrot.slane %v773_v18, 3  ;;  %907 = vrot.lane.b32.xlu1 %v896_v19, %s3059_s30  ;;  %v897_v24 = vrot.slane %v3353_v21, 1  ;;  %v894_v25 = vsel %vm886_vm1, %v888_v62, %v893_v11 }
 0x108   : > { %v900_v26 = vsel %vm886_vm1, %v895_v7, %v899_v16  ;;  %v952_v27 = vsel %vm942_vm2, %v947_v60, %v951_v12  ;;  %v1013_v28 = vsel %vm1002_vm3, %v1004_v61, %v1012_v13  ;;  %v954_v29 = vsel %vm942_vm2, %v949_v8, %v953_v17 }
 0x109   : > { %901 = vrot.lane.b32.xlu0 %v889_v3, %s3059_s30  ;;  %v898_v30 = vsel %vm886_vm1, %v893_v11, %v897_v24  ;;  %v956_v31 = vsel %vm942_vm2, %v951_v12, %v955_v22  ;;  %v1019_v32 = vsel %vm1002_vm3, %v1012_v13, %v1018_v23 }
 0x10b   : > { %961 = vrot.lane.b32.xlu1 %v950_v20, %s3060_s12 }
 0x10d   : > { %1024 = vrot.lane.b32.xlu0 %v1005_v4, %s3061_s16 }
 0x10f   : > { %911 = vrot.lane.b32.xlu1 %v900_v26, %s3059_s30 }
 0x111   : > { %905 = vrot.lane.b32.xlu0 %v894_v25, %s3059_s30 }
 0x113   : > { %913 = vrot.lane.b32.xlu1 %v897_v24, %s3059_s30 }
 0x114   : > { %v810_v33 = vpop.f32.mrb[8].mxu0  ;;  %v2667_v34 = vpop.f32.mrb[8].mxu1 }
 0x115   : > { %915 = vrot.lane.b32.xlu0 %v899_v16, %s3059_s30  ;;  %v1006_v35 = vrot.slane %v810_v33, 3  ;;  %v812_v36 = vpop.f32.mrb[9].mxu0  ;;  %v1086_v37 = vrot.slane %v2667_v34, 4  ;;  %v863_v38 = vpop.f32.mrb[9].mxu1 }
 0x116   : > { %v1009_v39 = vrot.slane %v812_v36, 3  ;;  %v1078_v40 = vrot.slane %v812_v36, 4  ;;  %v814_v41 = vpop.f32.mrb[10].mxu0  ;;  %v1081_v42 = vrot.slane %v863_v38, 4  ;;  %v2668_v43 = vpop.f32.mrb[10].mxu1  ;;  %v1130_v36 = vlaneseq }
 0x117   : > { %971 = vrot.lane.b32.xlu1 %v955_v22, %s3060_s12  ;;  %v1007_v44 = vrot.slane %v814_v41, 3  ;;  %v816_v45 = vpop.f32.mrb[11].mxu0  ;;  %v1090_v47 = vrot.slane %v2668_v43, 4  ;;  %v866_v49 = vpop.f32.mrb[11].mxu1 }
 0x118   : > { %v1010_v50 = vrot.slane %v816_v45, 3  ;;  %v1079_v51 = vrot.slane %v816_v45, 4  ;;  %v1082_v53 = vrot.slane %v866_v49, 4 }
 0x119   : > { %963 = vrot.lane.b32.xlu0 %v952_v27, %s3060_s12  ;;  %v1091_v54 = vsel %vm1077_vm4, %v1086_v37, %v1090_v47  ;;  %v1008_v55 = vsel %vm1002_vm3, %v1006_v35, %v1007_v44 }
 0x11a   : > { %v1011_v56 = vsel %vm1002_vm3, %v1009_v39, %v1010_v50  ;;  %v1083_v57 = vsel %vm1077_vm4, %v1081_v42, %v1082_v53  ;;  %v1080_v59 = vsel %vm1077_vm4, %v1078_v40, %v1079_v51  ;;  %v1087_v60 = vsel %vm1077_vm4, %v1082_v53, %v1086_v37 }
 0x11b   : > { %1042 = vrot.lane.b32.xlu1 %v1018_v23, %s3061_s16  ;;  %v3415_v39 = vshrl.u32 %v1130_v36, 7 }
 0x11c   : > { %v820_v61 = vpop.f32.mrb[12].mxu0 }
 0x11d   : > { %969 = vrot.lane.b32.xlu0 %v953_v17, %s3060_s12  ;;  %v1014_v62 = vrot.slane %v820_v61, 3  ;;  %v822_v63 = vpop.f32.mrb[13].mxu0  ;;  %v1136_v45 = vsub.s32 1, %v3415_v39 }
 0x11e   : > { %v1016_v0 = vrot.slane %v822_v63, 3  ;;  %v1084_v1 = vrot.slane %v822_v63, 4  ;;  %v824_v3 = vpop.f32.mrb[14].mxu0 }
 0x11f   : > { %909 = vrot.lane.b32.xlu1 %v898_v30, %s3059_s30  ;;  %v1020_v4 = vrot.slane %v824_v3, 3  ;;  %v826_v6 = vpop.f32.mrb[15].mxu0  ;;  %v1015_v7 = vsel %vm1002_vm3, %v1007_v44, %v1014_v62  ;;  %s3069_s30 = smov 112  }
 0x120   : > { %v1022_v8 = vrot.slane %v826_v6, 3  ;;  %v1088_v10 = vrot.slane %v826_v6, 4  ;;  %v1017_v11 = vsel %vm1002_vm3, %v1010_v50, %v1016_v0  ;;  %v1085_v12 = vsel %vm1077_vm4, %v1079_v51, %v1084_v1 }
 0x121   : > { %1030 = vrot.lane.b32.xlu0 %v1013_v28, %s3061_s16  ;;  %v1021_v13 = vsel %vm1002_vm3, %v1014_v62, %v1020_v4  ;;  %v1132_v51 = vsub.s32 0, %v3415_v39 }
 0x122   : > { %v1023_v14 = vsel %vm1002_vm3, %v1016_v0, %v1022_v8  ;;  %v1089_v16 = vsel %vm1077_vm4, %v1084_v1, %v1088_v10 }
 0x123   : > { %967 = vrot.lane.b32.xlu1 %v956_v31, %s3060_s12 }
 0x125   : > { %965 = vrot.lane.b32.xlu0 %v954_v29, %s3060_s12 }
 0x127   : > { %1036 = vrot.lane.b32.xlu1 %v1019_v32, %s3061_s16 }
 0x129   : > { %1102 = vrot.lane.b32.xlu0 %v1091_v54, %s3062_s14 }
 0x12b   : > { %1026 = vrot.lane.b32.xlu1 %v1008_v55, %s3061_s16 }
 0x12d   : > { %1028 = vrot.lane.b32.xlu0 %v1011_v56, %s3061_s16 }
 0x12f   : > { %1094 = vrot.lane.b32.xlu1 %v1083_v57, %s3062_s14 }
 0x131   : > { %1092 = vrot.lane.b32.xlu0 %v1080_v59, %s3062_s14 }
 0x133   : > { %1032 = vrot.lane.b32.xlu1 %v1015_v7, %s3061_s16 }
 0x135   : > { %1034 = vrot.lane.b32.xlu0 %v1017_v11, %s3061_s16 }
 0x137   : > { %1098 = vrot.lane.b32.xlu1 %v1087_v60, %s3062_s14 }
 0x139   : > { %1044 = vrot.lane.b32.xlu0 %v1020_v4, %s3061_s16 }
 0x13b   : > { %1046 = vrot.lane.b32.xlu1 %v1022_v8, %s3061_s16 }
 0x13d   : > { %1038 = vrot.lane.b32.xlu0 %v1021_v13, %s3061_s16 }
 0x13f   : > { %1040 = vrot.lane.b32.xlu1 %v1023_v14, %s3061_s16 }
 0x141   : > { %1096 = vrot.lane.b32.xlu0 %v1085_v12, %s3062_s14 }
 0x143   : > { %1100 = vrot.lane.b32.xlu1 %v1089_v16, %s3062_s14 }
 0x145   : > { %1104 = vrot.lane.b32.xlu0 %v1088_v10, %s3062_s14 }
 0x147   : > { %1106 = vrot.lane.b32.xlu1 %v1090_v47, %s3062_s14  ;;  %v1128_v47 = vld [vmem:[%s3904_s2] sm:$0x3] }
 0x148   : > { %v3432_v56 = vrot.slane %v1128_v47, %v1136_v45  ;;  %v3436_v61 = vrot.slane %v1128_v47, %v1132_v51  ;;  %v2870_v47 = vld [vmem:[%s3905_s3 + $0x4] ss:$28 sps:$4 sm:$0xff]  }
 0x149   : > { %1520 = vmatprep.subr.bf16.mxu0 %v2870_v47  ;;  %v3064_v47 = vmov 0.0  }
 0x173   : > { %v904_v17 = vpop.permute.xlu0 %903 }
 0x174   : > { %v960_v18 = vpop.permute.xlu1 %959  ;;  %v931_v41 = vadd.f32 %v904_v17, %v3328_v48 }
 0x176   : > { %v987_v49 = vadd.f32 %v960_v18, %v931_v41 }
 0x177   : > { %v958_v19 = vpop.permute.xlu0 %957 }
 0x178   : > { %v974_v53 = vsel %vm973_vm6, %v958_v19, %v960_v18 }
 0x179   : > { %v908_v20 = vpop.permute.xlu1 %907 }
 0x17a   : > { %v933_v7 = vadd.f32 %v908_v20, %v3333_v58 }
 0x17b   : > { %v902_v22 = vpop.permute.xlu0 %901 }
 0x17c   : > { %v918_v40 = vsel %vm917_vm5, %v902_v22, %v904_v17 }
 0x17d   : > { %v962_v23 = vpop.permute.xlu1 %961  ;;  %v930_v43 = vadd.f32 %v918_v40, %v3326_v46 }
 0x17f   : > { %v1025_v24 = vpop.permute.xlu0 %1024  ;;  %v986_v55 = vadd.f32 %v974_v53, %v930_v43 }
 0x181   : > { %v912_v25 = vpop.permute.xlu1 %911 }
 0x182   : > { %v935_v19 = vadd.f32 %v912_v25, %v3345_v9 }
 0x183   : > { %v906_v26 = vpop.permute.xlu0 %905 }
 0x184   : > { %v919_v13 = vsel %vm917_vm5, %v906_v26, %v908_v20 }
 0x185   : > { %v914_v27 = vpop.permute.xlu1 %913  ;;  %v932_v22 = vadd.f32 %v919_v13, %v3331_v52 }
 0x187   : > { %v916_v28 = vpop.permute.xlu0 %915 }
 0x188   : > { %v921_v58 = vsel %vm917_vm5, %v914_v27, %v916_v28  ;;  %v937_v36 = vadd.f32 %v916_v28, %v3353_v21 }
 0x189   : > { %v3409_v29 = vpop.permute.xlu1 %971  ;;  %v936_v9 = vadd.f32 %v921_v58, %v3349_v15  ;;  %v2889_v58 = vld [vmem:[%s3905_s3 + $0xb0] ss:$28 sps:$4 sm:$0xff]  }
 0x18b   : > { %v964_v30 = vpop.permute.xlu0 %963 }
 0x18c   : > { %v989_v11 = vadd.f32 %v964_v30, %v933_v7  ;;  %v975_v17 = vsel %vm973_vm6, %v962_v23, %v964_v30  ;;  %v2874_v7 = vld [vmem:[%s3905_s3 + $0x38] ss:$28 sps:$4 sm:$0xff]  }
 0x18d   : > { %v3411_v31 = vpop.permute.xlu1 %1042  ;;  %v988_v26 = vadd.f32 %v975_v17, %v932_v22  ;;  %v2886_v22 = vld [vmem:[%s3905_s3 + $0xa8] ss:$28 sps:$4 sm:$0xff]  }
 0x18f   : > { %v3413_v32 = vpop.permute.xlu0 %969 }
 0x190   : > { %v977_v21 = vsel %vm973_vm6, %v3413_v32, %v3409_v29  ;;  %v2873_v32 = vld [vmem:[%s3905_s3 + $0xc] ss:$28 sps:$4 sm:$0xff]  }
 0x191   : > { %v910_v33 = vpop.permute.xlu1 %909  ;;  %1563 = vmatprep.subr.bf16.mxu1 %v2873_v32 }
 0x192   : > { %v920_v18 = vsel %vm917_vm5, %v910_v33, %v912_v25 }
 0x193   : > { %v1031_v34 = vpop.permute.xlu0 %1030  ;;  %v934_v43 = vadd.f32 %v920_v18, %v3343_v5  ;;  %v993_v5 = vadd.f32 %v3409_v29, %v937_v36  ;;  %v2880_v18 = vld [vmem:[%s3905_s3 + $0x70] ss:$28 sps:$4 sm:$0xff]  }
 0x195   : > { %v968_v35 = vpop.permute.xlu1 %967 }
 0x196   : > { %v991_v23 = vadd.f32 %v968_v35, %v935_v19  ;;  %v2883_v19 = vld [vmem:[%s3905_s3 + $0x78] ss:$28 sps:$4 sm:$0xff]  }
 0x197   : > { %v966_v37 = vpop.permute.xlu0 %965 }
 0x198   : > { %v976_v40 = vsel %vm973_vm6, %v966_v37, %v968_v35 }
 0x199   : > { %v1037_v38 = vpop.permute.xlu1 %1036  ;;  %v990_v28 = vadd.f32 %v976_v40, %v934_v43 }
 0x19b   : > { %v3419_v42 = vpop.permute.xlu0 %1102 }
 0x19d   : > { %v1027_v44 = vpop.permute.xlu1 %1026 }
 0x19e   : > { %v1049_v48 = vsel %vm1048_vm7, %v1025_v24, %v1027_v44 }
 0x19f   : > { %v1029_v50 = vpop.permute.xlu0 %1028  ;;  %v1065_v59 = vadd.f32 %v1049_v48, %v986_v55  ;;  %v2871_v55 = vld [vmem:[%s3905_s3 + $0x8] ss:$28 sps:$4 sm:$0xff]  }
 0x1a0   : > { %v1050_v54 = vsel %vm1048_vm7, %v1027_v44, %v1029_v50  ;;  %1564 = vmatpush1.bf16.msra.mxu1 %v2871_v55 }
 0x1a1   : > { %v1066_v46 = vadd.f32 %v1050_v54, %v987_v49  ;;  %v1095_v57 = vpop.permute.xlu1 %1094  ;;  %v2868_v54 = vld [vmem:[%s3905_s3] ss:$28 sps:$4 sm:$0xff]  }
 0x1a2   : > { %1521 = vmatpush1.bf16.msra.mxu0 %v2868_v54 }
 0x1a3   : > { %v1121_v60 = vadd.f32 %v1095_v57, %v1066_v46  ;;  %v1093_v62 = vpop.permute.xlu0 %1092  ;;  %v992_v46 = vadd.f32 %v977_v21, %v936_v9  ;;  %v1293_v9 = vld [vmem:[%s3905_s3 + $0x118] sm:$0x33] }
 0x1a4   : > { %v1108_v63 = vsel %vm663_vm0, %v1093_v62, %v1095_v57  ;;  %v2539_v21 = vcombine.high %v1293_v9, %v1293_v9 }
 0x1a5   : > { %v1141_v0 = vadd.f32 %v3432_v56, %v1121_v60  ;;  %v1120_v1 = vadd.f32 %v1108_v63, %v1065_v59  ;;  %v1033_v3 = vpop.permute.xlu1 %1032 }
 0x1a6   : > { %v1051_v41 = vsel %vm1048_vm7, %v1031_v34, %v1033_v3 }
 0x1a7   : > { %v1140_v4 = vadd.f32 %v3436_v61, %v1120_v1  ;;  %v1035_v6 = vpop.permute.xlu0 %1034  ;;  %2966 = vtanh.f32 %v1141_v0  ;;  %v1067_v34 = vadd.f32 %v1051_v41, %v988_v26  ;;  %v2894_v41 = vld [vmem:[%s3905_s3 + $0xe4] ss:$28 sps:$4 sm:$0xff]  }
 0x1a8   : > { %v1052_v8 = vsel %vm1048_vm7, %v1033_v3, %v1035_v6 }
 0x1a9   : > { %2968 = vtanh.f32 %v1140_v4  ;;  %v1099_v10 = vpop.permute.xlu1 %1098  ;;  %v1068_v14 = vadd.f32 %v1052_v8, %v989_v11  ;;  %v2877_v8 = vld [vmem:[%s3905_s3 + $0x40] ss:$28 sps:$4 sm:$0xff]  }
 0x1ab   : > { %v1045_v12 = vpop.permute.xlu0 %1044  ;;  %v1123_v20 = vadd.f32 %v1099_v10, %v1068_v14  ;;  %v2882_v14 = vld [vmem:[%s3905_s3 + $0x74] ss:$28 sps:$4 sm:$0xff]  }
 0x1ac   : > { %v1055_v57 = vsel %vm1048_vm7, %v3411_v31, %v1045_v12  ;;  %v2876_v31 = vld [vmem:[%s3905_s3 + $0x3c] ss:$28 sps:$4 sm:$0xff]  }
 0x1ad   : > { %v1047_v16 = vpop.permute.xlu1 %1046  ;;  %v1143_v35 = vadd.f32 %v3432_v56, %v1123_v20  ;;  %v1071_v1 = vadd.f32 %v1055_v57, %v992_v46  ;;  %1522 = vmatprep.subr.bf16.mxu0 %v2876_v31  ;;  %v2897_v20 = vld [vmem:[%s3905_s3 + $0xec] ss:$28 sps:$4 sm:$0xff]  }
 0x1ae   : > { %v1056_v49 = vsel %vm1048_vm7, %v1045_v12, %v1047_v16  ;;  %1523 = vmatpush1.bf16.msra.mxu0 %v2874_v7  ;;  %v2885_v16 = vld [vmem:[%s3905_s3 + $0x7c] ss:$28 sps:$4 sm:$0xff]  }
 0x1af   : > { %v1039_v24 = vpop.permute.xlu0 %1038  ;;  %2970 = vtanh.f32 %v1143_v35  ;;  %v1072_v0 = vadd.f32 %v1056_v49, %v993_v5  ;;  %1524 = vmatprep.subr.bf16.mxu0 %v2882_v14 }
 0x1b0   : > { %v1053_v52 = vsel %vm1048_vm7, %v1037_v38, %v1039_v24 }
 0x1b1   : > { %v1041_v30 = vpop.permute.xlu1 %1040  ;;  %v2967_v33 = vpop.eup %2966  ;;  %v1069_v50 = vadd.f32 %v1053_v52, %v990_v28  ;;  %v1294_v52 = vld [vmem:[%s3905_s3 + $0x120] sm:$0x33] }
 0x1b2   : > { %v1054_v25 = vsel %vm1048_vm7, %v1039_v24, %v1041_v30  ;;  %1525 = vmatpush1.bf16.msra.mxu0 %v2880_v18  ;;  %v2895_v30 = vld [vmem:[%s3905_s3 + $0xe8] ss:$28 sps:$4 sm:$0xff]   ;;  %v2541_v28 = vcombine.high %v1294_v52, %v1294_v52 }
 0x1b3   : > { %v3456_v27 = vpop.eup %2968  ;;  %v1070_v37 = vadd.f32 %v1054_v25, %v991_v23  ;;  %v1097_v44 = vpop.permute.xlu0 %1096  ;;  %v2892_v23 = vld [vmem:[%s3905_s3 + $0xe0] ss:$28 sps:$4 sm:$0xff]  }
 0x1b4   : > { %v1109_v15 = vsel %vm663_vm0, %v1097_v44, %v1099_v10  ;;  %v2776_v38 = vpack.i.bf16 %v2967_v33, %v3456_v27  ;;  %v2540_v44 = vcombine.low %v1294_v52, %v1294_v52 }
 0x1b5   : > { %v1125_v53 = vadd.f32 %v3419_v42, %v1070_v37  ;;  %v1122_v29 = vadd.f32 %v1109_v15, %v1067_v34  ;;  %v1101_v48 = vpop.permute.xlu1 %1100  ;;  %v2538_v34 = vcombine.low %v1293_v9, %v1293_v9 }
 0x1b6   : > { %v1110_v59 = vsel %vm663_vm0, %v1101_v48, %v3419_v42  ;;  %2777 = vrot.lane.b32.xlu0 %v2776_v38, %s3063_s26  ;;  %v2879_v42 = vld [vmem:[%s3905_s3 + $0x44] ss:$28 sps:$4 sm:$0xff]   ;;  %v1506_v15 = vsel %vm1239_vm8, %v2540_v44, 0  ;;  %v2904_v38 = vld [vmem:[%s3905_s3 + $0x14] ss:$28 sps:$4 sm:$0xff]  }
 0x1b7   : > { %v1145_v60 = vadd.f32 %v3432_v56, %v1125_v53  ;;  %v1142_v62 = vadd.f32 %v3436_v61, %v1122_v29  ;;  %v1124_v63 = vadd.f32 %v1110_v59, %v1069_v50  ;;  %v1105_v4 = vpop.permute.xlu0 %1104  ;;  %1565 = vmatprep.subr.bf16.mxu1 %v2879_v42  ;;  %v1500_v35 = vsel %vm1239_vm8, %v2538_v34, 0  ;;  %v2902_v34 = vld [vmem:[%s3905_s3 + $0x10] ss:$28 sps:$4 sm:$0xff]  }
 0x1b8   : > { %1566 = vmatpush1.bf16.msra.mxu1 %v2877_v8 }
 0x1b9   : > { %2972 = vtanh.f32 %v1145_v60  ;;  %v1144_v3 = vadd.f32 %v3436_v61, %v1124_v63  ;;  %v1107_v6 = vpop.permute.xlu1 %1106  ;;  %1567 = vmatprep.subr.bf16.mxu1 %v2885_v16  ;;  %v2971_v24 = vpop.eup %2970 }
 0x1ba   : > { %2974 = vtanh.f32 %v1142_v62  ;;  %v1111_v10 = vsel %vm663_vm0, %v1105_v4, %v1107_v6  ;;  %v1127_v11 = vadd.f32 %v1107_v6, %v1072_v0 }
 0x1bb   : > { %2976 = vtanh.f32 %v1144_v3  ;;  %v1126_v12 = vadd.f32 %v1111_v10, %v1071_v1 }
 0x1bc   : > { %v1147_v13 = vadd.f32 %v3432_v56, %v1127_v11  ;;  %1568 = vmatpush1.bf16.msra.mxu1 %v2883_v19  ;;  %v2888_v56 = vld [vmem:[%s3905_s3 + $0xac] ss:$28 sps:$4 sm:$0xff]  }
 0x1bd   : > { %v1146_v17 = vadd.f32 %v3436_v61, %v1126_v12  ;;  %v2891_v61 = vld [vmem:[%s3905_s3 + $0xb4] ss:$28 sps:$4 sm:$0xff]   ;;  %1526 = vmatprep.subr.bf16.mxu0 %v2888_v56 }
 0x1be   : > { %2978 = vtanh.f32 %v1147_v13  ;;  %1569 = vmatprep.subr.bf16.mxu1 %v2891_v61  ;;  %1527 = vmatpush1.bf16.msra.mxu0 %v2886_v22 }
 0x1bf   : > { %2980 = vtanh.f32 %v1146_v17  ;;  %1528 = vmatprep.subr.bf16.mxu0 %v2894_v41 }
 0x1c0   : > { %1570 = vmatpush1.bf16.msra.mxu1 %v2889_v58 }
 0x1c1   : > { %1571 = vmatprep.subr.bf16.mxu1 %v2897_v20 }
 0x1c2   : > { %1529 = vmatpush1.bf16.msra.mxu0 %v2892_v23 }
 0x1c3   : > { %v2973_v36 = vpop.eup %2972  ;;  %2545 = vmatprep.subr.msk.bf16.mxu0 %vm1239_vm8, %v2539_v21 }
 0x1c4   : > { %v2975_v40 = vpop.eup %2974  ;;  %1572 = vmatpush1.bf16.msra.mxu1 %v2895_v30 }
 0x1c5   : > { %v2977_v26 = vpop.eup %2976  ;;  %v2781_v43 = vpack.i.bf16 %v2971_v24, %v2975_v40  ;;  %2547 = vmatprep.subr.msk.bf16.mxu1 %vm1239_vm8, %v2541_v28 }
 0x1c6   : > { %v2786_v33 = vpack.i.bf16 %v2973_v36, %v2977_v26  ;;  %1531 = vmatpush1.bf16.msra.mxu0 %v1500_v35  ;;  %v2906_v35 = vld [vmem:[%s3905_s3 + $0x48] ss:$28 sps:$4 sm:$0xff]  }
 0x1c7   : > { %2782 = vrot.lane.b32.xlu0 %v2781_v43, %s3063_s26  ;;  %1606 = vmatprep.subr.bf16.mxu0 %v2904_v38  ;;  %v2912_v38 = vld [vmem:[%s3905_s3 + $0x84] ss:$28 sps:$4 sm:$0xff]  }
 0x1c8   : > { %v2979_v25 = vpop.eup %2978  ;;  %2787 = vrot.lane.b32.xlu1 %v2786_v33, %s3063_s26  ;;  %1574 = vmatpush1.bf16.msra.mxu1 %v1506_v15  ;;  %v2909_v15 = vld [vmem:[%s3905_s3 + $0x50] ss:$28 sps:$4 sm:$0xff]  }
 0x1c9   : > { %v2981_v37 = vpop.eup %2980  ;;  %2669 = vmatprep.subr.bf16.mxu1 %v3064_v47 }
 0x1ca   : > { %v2791_v5 = vpack.i.bf16 %v2979_v25, %v2981_v37 }
 0x1cc   : > { %2792 = vrot.lane.b32.xlu1 %v2791_v5, %s3063_s26  ;;  %v2908_v5 = vld [vmem:[%s3905_s3 + $0x4c] ss:$28 sps:$4 sm:$0xff]  }
 0x228   : > { %v2778_v32 = vpop.permute.xlu0 %2777 }
 0x229   : > { %v2780_v49 = vunpack.i.h.bf16 %v2778_v32  ;;  %v2779_v50 = vunpack.i.l.bf16 %v2778_v32  ;;  %v2910_v32 = vld [vmem:[%s3905_s3 + $0x80] ss:$28 sps:$4 sm:$0xff]  }
 0x22b   : > { %v1181_v53 = vsel %vm1180_vm9, %v2779_v50, %v2780_v49  ;;  %v2913_v49 = vld [vmem:[%s3905_s3 + $0x88] ss:$28 sps:$4 sm:$0xff]   ;;  %v2916_v50 = vld [vmem:[%s3905_s3 + $0xbc] ss:$28 sps:$4 sm:$0xff]  }
 0x22c   : > { %v1189_v29 = vmax.f32 %v3456_v27, %v1181_v53  ;;  %v2914_v53 = vld [vmem:[%s3905_s3 + $0xb8] ss:$28 sps:$4 sm:$0xff]  }
 0x22e   : > { %v1194_v48 = vrot.slane %v1189_v29, 1 }
 0x230   : > { %v1196_v54 = vmax.f32 %v1189_v29, %v1194_v48  ;;  %v2917_v29 = vld [vmem:[%s3905_s3 + $0xc0] ss:$28 sps:$4 sm:$0xff]   ;;  %v2920_v48 = vld [vmem:[%s3905_s3 + $0xf4] ss:$28 sps:$4 sm:$0xff]  }
 0x232   : > { %v1210_v46 = vrot.slane %v1196_v54, 1  ;;  %v1212_v31 = vrot.slane %v1196_v54, 2  ;;  %v1214_v14 = vrot.slane %v1196_v54, 3 }
 0x234   : > { %v1238_v3 = vsel %vm1237_vm10, %v1196_v54, %v1210_v46  ;;  %v1295_v54 = vld [vmem:[%s3905_s3 + $0x128] sm:$0x33]  ;;  %v2921_v46 = vld [vmem:[%s3905_s3 + $0xf8] ss:$28 sps:$4 sm:$0xff]  }
 0x235   : > { %v1240_v11 = vsel %vm1239_vm8, %v1238_v3, %v1212_v31 }
 0x236   : > { %v1242_v22 = vsel %vm1241_vm11, %v1240_v11, %v1214_v14 }
 0x239   : > { %v2783_v55 = vpop.permute.xlu0 %2782 }
 0x23a   : > { %v2785_v57 = vunpack.i.h.bf16 %v2783_v55  ;;  %v2784_v59 = vunpack.i.l.bf16 %v2783_v55  ;;  %v2788_v60 = vpop.permute.xlu1 %2787  ;;  %v2918_v55 = vld [vmem:[%s3905_s3 + $0xf0] ss:$28 sps:$4 sm:$0xff]  }
 0x23b   : > { %v2790_v62 = vunpack.i.h.bf16 %v2788_v60  ;;  %v2789_v63 = vunpack.i.l.bf16 %v2788_v60  ;;  %v2924_v60 = vld [vmem:[%s3905_s3 + $0x130] ss:$0 sps:$4 sm:$0x33]  }
 0x23c   : > { %v1182_v0 = vsel %vm1180_vm9, %v2784_v59, %v2785_v57  ;;  %v2543_v57 = vcombine.high %v1295_v54, %v1295_v54  ;;  %v2542_v59 = vcombine.low %v1295_v54, %v1295_v54 }
 0x23d   : > { %v1190_v42 = vmax.f32 %v2975_v40, %v1182_v0  ;;  %v1183_v1 = vsel %vm1180_vm9, %v2789_v63, %v2790_v62  ;;  %v1518_v63 = vsel %vm1239_vm8, %v2924_v60, 0 }
 0x23e   : > { %v1191_v4 = vmax.f32 %v2977_v26, %v1183_v1  ;;  %v2793_v27 = vpop.permute.xlu1 %2792  ;;  %v1512_v62 = vsel %vm1239_vm8, %v2542_v59, 0 }
 0x23f   : > { %v1198_v6 = vrot.slane %v1190_v42, 1  ;;  %v2795_v7 = vunpack.i.h.bf16 %v2793_v27  ;;  %v2794_v8 = vunpack.i.l.bf16 %v2793_v27 }
 0x240   : > { %v1202_v10 = vrot.slane %v1191_v4, 1 }
 0x241   : > { %v1200_v12 = vmax.f32 %v1190_v42, %v1198_v6  ;;  %v1184_v13 = vsel %vm1180_vm9, %v2794_v8, %v2795_v7 }
 0x242   : > { %v1204_v16 = vmax.f32 %v1191_v4, %v1202_v10  ;;  %v1192_v17 = vmax.f32 %v2981_v37, %v1184_v13  ;;  %v2905_v37 = vld [vmem:[%s3905_s3 + $0x18] ss:$28 sps:$4 sm:$0xff]  }
 0x243   : > { %v1217_v18 = vrot.slane %v1200_v12, 4  ;;  %v1219_v19 = vrot.slane %v1200_v12, 5  ;;  %v1221_v24 = vrot.slane %v1200_v12, 6  ;;  %v1223_v52 = vrot.slane %v1200_v12, 7 }
 0x244   : > { %v1226_v56 = vrot.slane %v1204_v16, 1  ;;  %v1228_v61 = vrot.slane %v1204_v16, 2  ;;  %v1206_v58 = vrot.slane %v1192_v17, 1  ;;  %v1230_v40 = vrot.slane %v1204_v16, 3 }
 0x245   : > { %v1243_v36 = vsel %vm1077_vm4, %v1242_v22, %v1217_v18 }
 0x246   : > { %v1247_v41 = vsel %vm1237_vm10, %v1204_v16, %v1226_v56  ;;  %v1244_v20 = vsel %vm1002_vm3, %v1243_v36, %v1219_v19  ;;  %v1208_v26 = vmax.f32 %v1192_v17, %v1206_v58 }
 0x247   : > { %v1248_v43 = vsel %vm1239_vm8, %v1247_v41, %v1228_v61  ;;  %v1245_v23 = vsel %vm942_vm2, %v1244_v20, %v1221_v24 }
 0x248   : > { %v1233_v30 = vrot.slane %v1208_v26, 4  ;;  %v1235_v33 = vrot.slane %v1208_v26, 5  ;;  %v1249_v9 = vsel %vm1241_vm11, %v1248_v43, %v1230_v40  ;;  %v1246_v21 = vsel %vm886_vm1, %v1245_v23, %v1223_v52 }
 0x24a   : > { %v1250_v25 = vsel %vm1077_vm4, %v1249_v9, %v1233_v30 }
 0x24b   : > { %v1251_v28 = vsel %vm1002_vm3, %v1250_v25, %v1235_v33 }
 0x24c   : > { %v1252_v44 = vpack.c.bf16 %v1251_v28, %v1246_v21 }
 0x24e   : > { %2546 = vmatmul.mubr.msk.bf16.vlgmr.msra.gmra.mrb[16].mxu0 %vm1495_vm12, %v1252_v44  ;;  %2548 = vmatmul.mubr.msk.bf16.vlgmr.msra.gmra.mrb[12].mxu1 %vm1495_vm12, %v1252_v44 }
 0x24f   : > { %1607 = vmatpush1.bf16.msra.mxu0 %v2902_v34  ;;  %2670 = vmatpush3.bf16.msra.mxu1 %v2905_v37 }
 0x250   : > { %1608 = vmatprep.subr.bf16.mxu0 %v2908_v5  ;;  %2671 = vmatprep.subr.bf16.mxu1 %v3064_v47 }
 0x251   : > { %1638 = vmatprep.mubr.bf16.mxu0 %v3058_v2  ;;  %2681 = vmatprep.mubr.msk.bf16.mxu1 %vm3065_vm13, %v3064_v47 }
 0x253   : > { %1609 = vmatpush1.bf16.msra.mxu0 %v2906_v35  ;;  %2672 = vmatpush3.bf16.msra.mxu1 %v2909_v15 }
 0x254   : > { %1610 = vmatprep.subr.bf16.mxu0 %v2912_v38  ;;  %2673 = vmatprep.subr.bf16.mxu1 %v3064_v47 }
 0x257   : > { %1611 = vmatpush1.bf16.msra.mxu0 %v2910_v32  ;;  %2674 = vmatpush3.bf16.msra.mxu1 %v2913_v49 }
 0x258   : > { %1612 = vmatprep.subr.bf16.mxu0 %v2916_v50  ;;  %2675 = vmatprep.subr.bf16.mxu1 %v3064_v47 }
 0x25b   : > { %1613 = vmatpush1.bf16.msra.mxu0 %v2914_v53  ;;  %2676 = vmatpush3.bf16.msra.mxu1 %v2917_v29 }
 0x25c   : > { %1614 = vmatprep.subr.bf16.mxu0 %v2920_v48  ;;  %2677 = vmatprep.subr.bf16.mxu1 %v3064_v47 }
 0x25f   : > { %1615 = vmatpush1.bf16.msra.mxu0 %v2918_v55  ;;  %2678 = vmatpush3.bf16.msra.mxu1 %v2921_v46  ;;  %v1790_v46 = vld [vmem:[%s3906_s4] sm:$0x3] }
 0x260   : > { %2549 = vmatprep.subr.msk.bf16.mxu0 %vm1239_vm8, %v2543_v57  ;;  %2679 = vmatprep.subr.bf16.mxu1 %v3064_v47 }
 0x263   : > { %1617 = vmatpush1.bf16.msra.mxu0 %v1512_v62  ;;  %2680 = vmatpush3.bf16.msra.mxu1 %v1518_v63 }
 0x264   : > { %2122 = vmatprep.subr.bf16.mxu1 %v3058_v2 }
 0x266   : > { %2550 = vmatmul.mubr.msk.bf16.vlgmr.msra.gmra.mrb[20].mxu0 %vm1495_vm12, %v1252_v44  ;;  %2682 = vmatmul.mubr.msk.bf16.vlgmr.msra.gmra.mrb[16].mxu1 %vm1495_vm12, %v1252_v44 }
 0x321   : > { %v3636_v0 = vpop.f32.mrb[16].mxu0  ;;  %v1597_v31 = vpop.f32.mrb[12].mxu1 }
 0x322   : > { %v1556_v42 = vpop.f32.mrb[17].mxu0  ;;  %v1599_v1 = vpop.f32.mrb[13].mxu1  ;;  %v1697_v3 = vrot.slane %v1597_v31, 1  ;;  %v1720_v4 = vrot.slane %v1597_v31, 2 }
 0x323   : > { %v3638_v27 = vpop.f32.mrb[18].mxu0  ;;  %v1601_v6 = vpop.f32.mrb[14].mxu1  ;;  %v1694_v7 = vrot.slane %v1556_v42, 1  ;;  %v1723_v8 = vrot.slane %v1599_v1, 2  ;;  %v1747_v14 = vrot.slane %v1599_v1, 3 }
 0x324   : > { %v1698_v10 = vrot.slane %v1601_v6, 1  ;;  %v1721_v11 = vrot.slane %v1601_v6, 2  ;;  %v3640_v12 = vpop.f32.mrb[19].mxu0  ;;  %v1603_v13 = vpop.f32.mrb[15].mxu1 }
 0x325   : > { %v1695_v16 = vrot.slane %v3640_v12, 1  ;;  %v1724_v17 = vrot.slane %v1603_v13, 2  ;;  %v1748_v18 = vrot.slane %v1603_v13, 3 }
 0x326   : > { %1730 = vrot.lane.b32.xlu0 %v1721_v11, %s3066_s25  ;;  %1706 = vrot.lane.b32.xlu1 %v1698_v10, %s3062_s14  ;;  %v1722_v19 = vsel %vm942_vm2, %v1720_v4, %v1721_v11  ;;  %v1699_v56 = vsel %vm886_vm1, %v1697_v3, %v1698_v10  ;;  %v1795_v3 = vrot.slane %v1790_v46, %v1132_v51 }
 0x327   : > { %v1725_v61 = vsel %vm942_vm2, %v1723_v8, %v1724_v17  ;;  %v1696_v22 = vsel %vm886_vm1, %v1694_v7, %v1695_v16  ;;  %v1749_v58 = vsel %vm1002_vm3, %v1747_v14, %v1748_v18  ;;  %vm1870_vm1 = vcmask 916480  }
 0x328   : > { %vm2078_vm2 = vcmask 130048  }
 0x32a   : > { %1726 = vrot.lane.b32.xlu0 %v1722_v19, %s3066_s25  ;;  %1702 = vrot.lane.b32.xlu1 %v1699_v56, %s3062_s14 }
 0x32e   : > { %1732 = vrot.lane.b32.xlu1 %v1724_v17, %s3066_s25  ;;  %1704 = vrot.lane.b32.xlu0 %v1695_v16, %s3062_s14 }
 0x332   : > { %1728 = vrot.lane.b32.xlu1 %v1725_v61, %s3066_s25  ;;  %1700 = vrot.lane.b32.xlu0 %v1696_v22, %s3062_s14 }
 0x336   : > { %1753 = vrot.lane.b32.xlu0 %v1749_v58, %s3067_s19 }
 0x339   : > { %v1640_v24 = vpop.f32.mrb[20].mxu0  ;;  %v1683_v36 = vpop.f32.mrb[16].mxu1 }
 0x33a   : > { %v1642_v40 = vpop.f32.mrb[21].mxu0  ;;  %v2683_v41 = vpop.f32.mrb[17].mxu1  ;;  %1757 = vrot.lane.b32.xlu0 %v1748_v18, %s3067_s19  ;;  %v1750_v43 = vrot.slane %v1640_v24, 3  ;;  %v1779_v23 = vrot.slane %v1683_v36, 4 }
 0x33b   : > { %v1686_v20 = vpop.f32.mrb[18].mxu1  ;;  %v1644_v26 = vpop.f32.mrb[22].mxu0  ;;  %v1776_v25 = vrot.slane %v1642_v40, 4  ;;  %v2925_v40 = vld [vmem:[%s3907_s5 + $0x80] sm:$0xff]  }
 0x33c   : > { %v1780_v30 = vrot.slane %v1686_v20, 4  ;;  %v1751_v33 = vrot.slane %v1644_v26, 3  ;;  %v1646_v9 = vpop.f32.mrb[23].mxu0  ;;  %v2684_v52 = vpop.f32.mrb[19].mxu1  ;;  %v2926_v41 = vld [vmem:[%s3907_s5 + $0x40] sm:$0xff]   ;;  %v2929_v26 = vld [vmem:[%s3907_s5 + $0x48] sm:$0xff]   ;;  %2123 = vmatpush1.bf16.msra.mxu1 %v2925_v40 }
 0x33d   : > { %v1777_v21 = vrot.slane %v1646_v9, 4  ;;  %v2928_v20 = vld [vmem:[%s3907_s5] sm:$0xff]   ;;  %2613 = vmatprep.subr.bf16.mxu0 %v2926_v41  ;;  %2124 = vmatprep.subr.bf16.mxu1 %v3058_v2  ;;  %v2934_v9 = vld [vmem:[%s3907_s5 + $0x10] sm:$0xff]   ;;  %v2935_v52 = vld [vmem:[%s3907_s5 + $0x58] sm:$0xff]  }
 0x33e   : > { %v1752_v28 = vsel %vm1002_vm3, %v1750_v43, %v1751_v33  ;;  %v1781_v34 = vsel %vm1077_vm4, %v1779_v23, %v1780_v30  ;;  %v2927_v43 = vld [vmem:[%s3907_s5 + $0x88] sm:$0xff]   ;;  %2614 = vmatpush3.bf16.msra.mxu0 %v2928_v20  ;;  %v2952_v20 = vld [vmem:[%s3909_s7 + $0x10] sm:$0xff]  }
 0x33f   : > { %v1778_v37 = vsel %vm1077_vm4, %v1776_v25, %v1777_v21  ;;  %1755 = vrot.lane.b32.xlu1 %v1752_v28, %s3067_s19  ;;  %v2931_v23 = vld [vmem:[%s3907_s5 + $0x8] sm:$0xff]   ;;  %2615 = vmatprep.subr.bf16.mxu0 %v2929_v26  ;;  %v2933_v25 = vld [vmem:[%s3907_s5 + $0x98] sm:$0xff]   ;;  %v2938_v28 = vld [vmem:[%s3907_s5 + $0x60] sm:$0xff]  }
 0x340   : > { %2125 = vmatpush1.bf16.msra.mxu1 %v2927_v43  ;;  %v2951_v41 = vld [vmem:[%s3909_s7 + $0x8] sm:$0xff]   ;;  %v2953_v26 = vld [vmem:[%s3909_s7 + $0x18] sm:$0xff]   ;;  %v2954_v43 = vld [vmem:[%s3909_s7 + $0x20] sm:$0xff]  }
 0x341   : > { %2126 = vmatprep.subr.bf16.mxu1 %v3058_v2 }
 0x342   : > { %2616 = vmatpush3.bf16.msra.mxu0 %v2931_v23  ;;  %v2955_v23 = vld [vmem:[%s3909_s7 + $0x28] sm:$0xff]  }
 0x343   : > { %1759 = vrot.lane.b32.xlu1 %v1751_v33, %s3067_s19  ;;  %v2930_v33 = vld [vmem:[%s3907_s5 + $0x90] sm:$0xff]  }
 0x344   : > { %2127 = vmatpush1.bf16.msra.mxu1 %v2930_v33  ;;  %v2957_v33 = vld [vmem:[%s3909_s7 + $0x38] sm:$0xff]  }
 0x345   : > { %2128 = vmatprep.subr.bf16.mxu1 %v3058_v2 }
 0x348   : > { %2129 = vmatpush1.bf16.msra.mxu1 %v2933_v25  ;;  %v2960_v25 = vld [vmem:[%s3911_s9 + $0x10] sm:$0xff]  }
 0x349   : > { %2130 = vmatprep.subr.bf16.mxu1 %v3058_v2 }
 0x398   : > { %v1731_v44 = vpop.permute.xlu0 %1730  ;;  %v1707_v5 = vpop.permute.xlu1 %1706 }
 0x399   : > { %v1717_v31 = vadd.f32 %v1707_v5, %v3640_v12 }
 0x39c   : > { %v1727_v35 = vpop.permute.xlu0 %1726  ;;  %v1703_v15 = vpop.permute.xlu1 %1702 }
 0x39d   : > { %v1715_v48 = vadd.f32 %v1703_v15, %v1556_v42 }
 0x3a0   : > { %v1705_v38 = vpop.permute.xlu0 %1704  ;;  %v1733_v32 = vpop.permute.xlu1 %1732 }
 0x3a1   : > { %v1709_v54 = vsel %vm663_vm0, %v1705_v38, %v1707_v5  ;;  %v1736_v6 = vsel %vm1734_vm14, %v1731_v44, %v1733_v32  ;;  %v1744_v7 = vadd.f32 %v1733_v32, %v1717_v31  ;;  %v2941_v44 = vld [vmem:[%s3907_s5 + $0x68] sm:$0xff]   ;;  %v2947_v31 = vld [vmem:[%s3907_s5 + $0x78] sm:$0xff]  }
 0x3a2   : > { %v1716_v60 = vadd.f32 %v1709_v54, %v3638_v27  ;;  %v2939_v5 = vld [vmem:[%s3907_s5 + $0xa8] sm:$0xff]   ;;  %v2945_v54 = vld [vmem:[%s3907_s5 + $0xb8] sm:$0xff]  }
 0x3a4   : > { %v1701_v49 = vpop.permute.xlu0 %1700  ;;  %v1729_v53 = vpop.permute.xlu1 %1728  ;;  %v1743_v11 = vadd.f32 %v1736_v6, %v1716_v60 }
 0x3a5   : > { %v1708_v50 = vsel %vm663_vm0, %v1701_v49, %v1703_v15  ;;  %v1735_v57 = vsel %vm1734_vm14, %v1727_v35, %v1729_v53  ;;  %v1742_v59 = vadd.f32 %v1729_v53, %v1715_v48  ;;  %v2943_v35 = vld [vmem:[%s3907_s5 + $0x28] sm:$0xff]   ;;  %v2942_v15 = vld [vmem:[%s3907_s5 + $0xb0] sm:$0xff]   ;;  %vm1867_vm0 = vcmask 654336  }
 0x3a6   : > { %v1714_v29 = vadd.f32 %v1708_v50, %v3636_v0  ;;  %v1799_v0 = vrot.slane %v1790_v46, %v1136_v45  ;;  %v2944_v48 = vld [vmem:[%s3907_s5 + $0x70] sm:$0xff]  }
 0x3a8   : > { %v1754_v55 = vpop.permute.xlu0 %1753  ;;  %v1741_v62 = vadd.f32 %v1735_v57, %v1714_v29  ;;  %v2946_v57 = vld [vmem:[%s3907_s5 + $0x30] sm:$0xff]  }
 0x3ac   : > { %v1758_v10 = vpop.permute.xlu0 %1757 }
 0x3b1   : > { %v1756_v63 = vpop.permute.xlu1 %1755 }
 0x3b2   : > { %v1762_v42 = vsel %vm1761_vm15, %v1754_v55, %v1756_v63  ;;  %v1769_v1 = vadd.f32 %v1756_v63, %v1742_v59 }
 0x3b3   : > { %v1768_v4 = vadd.f32 %v1762_v42, %v1741_v62  ;;  %v2949_v42 = vld [vmem:[%s3907_s5 + $0x38] sm:$0xff]  }
 0x3b4   : > { %v1787_v8 = vadd.f32 %v1781_v34, %v1769_v1  ;;  %v2936_v34 = vld [vmem:[%s3907_s5 + $0xa0] sm:$0xff]  }
 0x3b5   : > { %v1786_v27 = vadd.f32 %v1778_v37, %v1768_v4  ;;  %v1760_v13 = vpop.permute.xlu1 %1759  ;;  %v2940_v37 = vld [vmem:[%s3907_s5 + $0x20] sm:$0xff]   ;;  %2131 = vmatpush1.bf16.msra.mxu1 %v2936_v34 }
 0x3b6   : > { %v1803_v14 = vadd.f32 %v1799_v0, %v1787_v8  ;;  %v1763_v12 = vsel %vm1761_vm15, %v1758_v10, %v1760_v13  ;;  %v1771_v16 = vadd.f32 %v1760_v13, %v1744_v7  ;;  %2132 = vmatprep.subr.bf16.mxu1 %v3058_v2 }
 0x3b7   : > { %v1802_v45 = vadd.f32 %v1795_v3, %v1786_v27  ;;  %v1770_v17 = vadd.f32 %v1763_v12, %v1743_v11 }
 0x3b8   : > { %2982 = vtanh.f32 %v1803_v14  ;;  %v1789_v18 = vadd.f32 %v1780_v30, %v1771_v16  ;;  %v2932_v30 = vld [vmem:[%s3907_s5 + $0x50] sm:$0xff]  }
 0x3b9   : > { %2984 = vtanh.f32 %v1802_v45  ;;  %v1788_v39 = vadd.f32 %v1777_v21, %v1770_v17  ;;  %2617 = vmatprep.subr.bf16.mxu0 %v2932_v30  ;;  %v2937_v21 = vld [vmem:[%s3907_s5 + $0x18] sm:$0xff]   ;;  %2133 = vmatpush1.bf16.msra.mxu1 %v2939_v5  ;;  %v2956_v30 = vld [vmem:[%s3909_s7 + $0x30] sm:$0xff]  }
 0x3ba   : > { %v1805_v51 = vadd.f32 %v1799_v0, %v1789_v18  ;;  %2618 = vmatpush3.bf16.msra.mxu0 %v2934_v9  ;;  %2134 = vmatprep.subr.bf16.mxu1 %v3058_v2  ;;  %v2948_v0 = vld [vmem:[%s3907_s5 + $0xc0] sm:$0xff]  }
 0x3bb   : > { %v1804_v19 = vadd.f32 %v1795_v3, %v1788_v39  ;;  %2619 = vmatprep.subr.bf16.mxu0 %v2935_v52  ;;  %v2958_v9 = vld [vmem:[%s3911_s9] sm:$0xff]   ;;  %v2959_v52 = vld [vmem:[%s3911_s9 + $0x8] sm:$0xff]  }
 0x3bc   : > { %2986 = vtanh.f32 %v1805_v51 }
 0x3bd   : > { %2988 = vtanh.f32 %v1804_v19  ;;  %2135 = vmatpush1.bf16.msra.mxu1 %v2942_v15 }
 0x3be   : > { %2620 = vmatpush3.bf16.msra.mxu0 %v2937_v21  ;;  %2136 = vmatprep.subr.bf16.mxu1 %v3058_v2  ;;  %v2961_v21 = vld [vmem:[%s3911_s9 + $0x18] sm:$0xff]  }
 0x3bf   : > { %2621 = vmatprep.subr.bf16.mxu0 %v2938_v28 }
 0x3c1   : > { %2137 = vmatpush1.bf16.msra.mxu1 %v2945_v54  ;;  %v2962_v54 = vld [vmem:[%s3911_s9 + $0x20] sm:$0xff]  }
 0x3c2   : > { %v2983_v56 = vpop.eup %2982  ;;  %2622 = vmatpush3.bf16.msra.mxu0 %v2940_v37  ;;  %2138 = vmatprep.subr.bf16.mxu1 %v3058_v2 }
 0x3c3   : > { %v2985_v61 = vpop.eup %2984  ;;  %2623 = vmatprep.subr.bf16.mxu0 %v2941_v44  ;;  %v1927_v44 = vld [vmem:[%s3908_s6] sm:$0x1] }
 0x3c4   : > { %v2796_v22 = vpack.i.bf16 %v2983_v56, %v2985_v61 }
 0x3c5   : > { %2139 = vmatpush1.bf16.msra.mxu1 %v2948_v0 }
 0x3c6   : > { %v2987_v58 = vpop.eup %2986  ;;  %2797 = vrot.lane.b32.xlu0 %v2796_v22, %s3060_s12  ;;  %2624 = vmatpush3.bf16.msra.mxu0 %v2943_v35 }
 0x3c7   : > { %v3680_v24 = vpop.eup %2988  ;;  %2625 = vmatprep.subr.bf16.mxu0 %v2944_v48  ;;  %2705 = vmatprep.subr.bf16.mxu1 %v3064_v47 }
 0x3c8   : > { %v2801_v36 = vpack.i.bf16 %v2987_v58, %v3680_v24 }
 0x3ca   : > { %2802 = vrot.lane.b32.xlu1 %v2801_v36, %s3060_s12  ;;  %2626 = vmatpush3.bf16.msra.mxu0 %v2946_v57  ;;  %v2950_v36 = vld [vmem:[%s3909_s7] sm:$0xff]   ;;  %v2965_v57 = vld [vmem:[%s3911_s9 + $0x38] sm:$0xff]  }
 0x3cb   : > { %2627 = vmatprep.subr.bf16.mxu0 %v2947_v31 }
 0x3ce   : > { %2628 = vmatpush3.bf16.msra.mxu0 %v2949_v42 }
 0x3cf   : > { %2685 = vmatprep.subr.bf16.mxu0 %v3064_v47 }
 0x438   : > { %v2798_v38 = vpop.permute.xlu0 %2797 }
 0x439   : > { %v2800_v32 = vunpack.i.h.bf16 %v2798_v38  ;;  %v2799_v49 = vunpack.i.l.bf16 %v2798_v38 }
 0x43b   : > { %v1822_v50 = vsel %vm973_vm6, %v2799_v49, %v2800_v32 }
 0x43c   : > { %v1826_v53 = vmax.f32 %v2985_v61, %v1822_v50  ;;  %v2803_v29 = vpop.permute.xlu1 %2802 }
 0x43d   : > { %v2805_v55 = vunpack.i.h.bf16 %v2803_v29  ;;  %v2804_v46 = vunpack.i.l.bf16 %v2803_v29 }
 0x43e   : > { %v1829_v59 = vrot.slane %v1826_v53, 1 }
 0x43f   : > { %v1823_v60 = vsel %vm973_vm6, %v2804_v46, %v2805_v55  ;;  %v2963_v55 = vld [vmem:[%s3911_s9 + $0x28] sm:$0xff]   ;;  %v2964_v46 = vld [vmem:[%s3911_s9 + $0x30] sm:$0xff]  }
 0x440   : > { %v1831_v62 = vmax.f32 %v1826_v53, %v1829_v59  ;;  %v1827_v63 = vmax.f32 %v3680_v24, %v1823_v60  ;;  %v2180_v59 = vld [vmem:[%s3910_s8] sm:$0x1] }
 0x442   : > { %v1837_v1 = vrot.slane %v1831_v62, 1  ;;  %v1839_v3 = vrot.slane %v1831_v62, 2  ;;  %v1833_v4 = vrot.slane %v1827_v63, 1  ;;  %v1841_v6 = vrot.slane %v1831_v62, 3 }
 0x444   : > { %v1835_v2 = vmax.f32 %v1827_v63, %v1833_v4  ;;  %v1846_v7 = vsel %vm1237_vm10, %v1831_v62, %v1837_v1 }
 0x445   : > { %v1847_v8 = vsel %vm1239_vm8, %v1846_v7, %v1839_v3 }
 0x446   : > { %v1844_v10 = vrot.slane %v1835_v2, 4  ;;  %v1848_v27 = vsel %vm1241_vm11, %v1847_v8, %v1841_v6 }
 0x448   : > { %v1849_v11 = vsel %vm1077_vm4, %v1848_v27, %v1844_v10 }
 0x449   : > { %v1855_v13 = vrot.slane %v1849_v11, 2  ;;  %v1851_v14 = vrot.slane %v1849_v11, 1  ;;  %v1863_v12 = vrot.slane %v1849_v11, 4  ;;  %v1859_v16 = vrot.slane %v1849_v11, 3 }
 0x44b   : > { %1856 = vrot.lane.b32.xlu1 %v1855_v13, %s3067_s19  ;;  %1852 = vrot.lane.b32.xlu0 %v1851_v14, %s3068_s29  ;;  %s377_s19 = sand.u32 1, %s3048_s18   ;;  %s3070_s29 = smov [#allocation2]  }
 0x44c   : > { %s378_s13 = scalar_lea.vmem [#allocation2], %s377_s19  ;;  %s2378_s12 = scalar_lea.sflag [#allocation3], %s377_s19 }
 0x44d   : > { %s2390_s26 = sshll.u32 %s378_s13, 4  ;;  %s3862_s26 = int_to_ptr.vmem [resolvable:$true] %s2390_s26 }
 0x44e   : > { %s2994_s21 = scalar_lea.vmem %s3862_s26, 16 }
 0x44f   : > { %1864 = vrot.lane.b32.xlu1 %v1863_v12, %s3066_s25  ;;  %1860 = vrot.lane.b32.xlu0 %v1859_v16, %s3069_s30  ;;  %p2995_p11 = scmp.ne.s32.totalorder %s3862_s26, %s2994_s21  ;;  %s2998_s30 = sshll.u32 %s3070_s29, 4  ;;  %s2999_s30 = int_to_ptr.vmem [resolvable:$false] %s2998_s30 }
 0x450   : > { %s3000_s25 = scalar_lea.vmem %s2999_s30, 32  ;;  %p3001_p0 = scmp.lt.s32.totalorder %s3862_s26, %s2999_s30 }
 0x451   : > { %p2996_p12 = pnand %p2995_p11, %p3169_p5  ;;  %p3002_p1 = scmp.lt.s32.totalorder %s3000_s25, %s2994_s21 }
 0x453   : > { %p2997_p13 = pneg %p2996_p12  ;;  %p3003_p2 = por %p3002_p1, %p3001_p0 }
 0x455   : > { %p3004_p3 = pnand %p3003_p2, %p2997_p13 }
 0x4bd   : > { %v1857_v45 = vpop.permute.xlu1 %1856  ;;  %v1853_v17 = vpop.permute.xlu0 %1852 }
 0x4be   : > { %v1868_v18 = vsel %vm1867_vm0, %v1849_v11, %v1853_v17  ;;  %v1869_v39 = vsel %vm1761_vm15, %v1853_v17, %v1857_v45 }
 0x4bf   : > { %v1873_v40 = vpack.c.bf16 %v1868_v18, %v1868_v18 }
 0x4c1   : > { %v1865_v51 = vpop.permute.xlu1 %1864  ;;  %v1861_v19 = vpop.permute.xlu0 %1860 }
 0x4c2   : > { %v1876_v56 = vpack.c.bf16 %v1865_v51, %v1865_v51  ;;  %v1871_v61 = vsel %vm1870_vm1, %v1869_v39, %v1861_v19  ;;  %v1872_v22 = vsel %vm1734_vm14, %v1861_v19, %v1865_v51 }
 0x4c3   : > { %v1874_v58 = vpack.c.bf16 %v1871_v61, %v1871_v61  ;;  %v1875_v24 = vpack.c.bf16 %v1872_v22, %v1872_v22 }
 0x4c4   : > { %2577 = vmatprep.mubr.msk.bf16.mxu1 %vm2078_vm2, %v1876_v56 }
 0x4c5   : > { %2114 = vmatprep.mubr.bf16.mxu0 %v1874_v58  ;;  %2155 = vmatmul.mubr.bf16.vlgmr.msra.gmra.mrb[20].mxu1 %v1875_v24 }
 0x4c6   : > { %2115 = vmatmul.mubr.bf16.vlgmr.msra.gmra.mrb[24].mxu0 %v1873_v40  ;;  %2721 = vmatprep.mubr.msk.bf16.mxu1 %vm3065_vm13, %v3064_v47 }
 0x4c7   : > { %2686 = vmatpush3.bf16.msra.mxu0 %v2950_v36  ;;  %2701 = vmatprep.mubr.msk.bf16.mxu0 %vm3065_vm13, %v3064_v47 }
 0x4c8   : > { %2687 = vmatprep.subr.bf16.mxu0 %v3064_v47  ;;  %2706 = vmatpush3.bf16.msra.mxu1 %v2958_v9 }
 0x4c9   : > { %2707 = vmatprep.subr.bf16.mxu1 %v3064_v47 }
 0x4cb   : > { %2688 = vmatpush3.bf16.msra.mxu0 %v2951_v41 }
 0x4cc   : > { %2689 = vmatprep.subr.bf16.mxu0 %v3064_v47  ;;  %2708 = vmatpush3.bf16.msra.mxu1 %v2959_v52 }
 0x4cd   : > { %2709 = vmatprep.subr.bf16.mxu1 %v3064_v47 }
 0x4cf   : > { %2690 = vmatpush3.bf16.msra.mxu0 %v2952_v20 }
 0x4d0   : > { %2691 = vmatprep.subr.bf16.mxu0 %v3064_v47  ;;  %2710 = vmatpush3.bf16.msra.mxu1 %v2960_v25 }
 0x4d1   : > { %2711 = vmatprep.subr.bf16.mxu1 %v3064_v47 }
 0x4d3   : > { %2692 = vmatpush3.bf16.msra.mxu0 %v2953_v26 }
 0x4d4   : > { %2693 = vmatprep.subr.bf16.mxu0 %v3064_v47  ;;  %2712 = vmatpush3.bf16.msra.mxu1 %v2961_v21 }
 0x4d5   : > { %2713 = vmatprep.subr.bf16.mxu1 %v3064_v47 }
 0x4d7   : > { %2694 = vmatpush3.bf16.msra.mxu0 %v2954_v43 }
 0x4d8   : > { %2695 = vmatprep.subr.bf16.mxu0 %v3064_v47  ;;  %2714 = vmatpush3.bf16.msra.mxu1 %v2962_v54 }
 0x4d9   : > { %2715 = vmatprep.subr.bf16.mxu1 %v3064_v47 }
 0x4db   : > { %2696 = vmatpush3.bf16.msra.mxu0 %v2955_v23 }
 0x4dc   : > { %2697 = vmatprep.subr.bf16.mxu0 %v3064_v47  ;;  %2716 = vmatpush3.bf16.msra.mxu1 %v2963_v55 }
 0x4dd   : > { %2717 = vmatprep.subr.bf16.mxu1 %v3064_v47 }
 0x4df   : > { %2698 = vmatpush3.bf16.msra.mxu0 %v2956_v30 }
 0x4e0   : > { %2699 = vmatprep.subr.bf16.mxu0 %v3064_v47  ;;  %2718 = vmatpush3.bf16.msra.mxu1 %v2964_v46 }
 0x4e1   : > { %2719 = vmatprep.subr.bf16.mxu1 %v3064_v47  ;;  %v2287_v47 = vld [vmem:[%s3912_s10] sm:$0x1] }
 0x4e3   : > { %2700 = vmatpush3.bf16.msra.mxu0 %v2957_v33 }
 0x4e4   : > { %2720 = vmatpush3.bf16.msra.mxu1 %v2965_v57 }
 0x598   : > { %v2156_v28 = vpop.f32.mrb[20].mxu1 }
 0x599   : > { %v2629_v34 = vpop.f32.mrb[24].mxu0  ;;  %v2158_v37 = vpop.f32.mrb[21].mxu1 }
 0x59a   : > { %v2630_v5 = vpop.f32.mrb[25].mxu0  ;;  %v2159_v35 = vpop.f32.mrb[22].mxu1 }
 0x59b   : > { %v2631_v15 = vadd.f32 %v2630_v5, %v2629_v34  ;;  %v2632_v38 = vpop.f32.mrb[26].mxu0  ;;  %v2160_v32 = vpop.f32.mrb[23].mxu1 }
 0x59c   : > { %v2633_v49 = vpop.f32.mrb[27].mxu0 }
 0x59d   : > { %v2117_v50 = vadd.f32 %v2631_v15, %v1927_v44 }
 0x59f   : > { %v2157_v53 = vadd.f32 %v2156_v28, %v2117_v50 }
 0x5a1   : > { %2990 = vtanh.f32 %v2157_v53 }
 0x5ab   : > { %v2991_v29 = vpop.eup %2990 }
 0x5ac   : > { %v2163_v48 = vpack.c.bf16 %v2991_v29, %v2991_v29 }
 0x5ae   : > { %2702 = vmatmul.mubr.bf16.vlgmr.msra.gmra.mrb[28].mxu0 %v2163_v48 }
 0x681   : > { %v2263_v60 = vpop.f32.mrb[28].mxu0 }
 0x682   : > { %v2264_v62 = vadd.f32 %v2263_v60, %v2180_v59  ;;  %v2703_v63 = vpop.f32.mrb[29].mxu0 }
 0x683   : > { %v2266_v31 = vpop.f32.mrb[30].mxu0 }
 0x684   : > { %2992 = vtanh.f32 %v2264_v62  ;;  %v2704_v0 = vpop.f32.mrb[31].mxu0 }
 0x68e   : > { %v2993_v42 = vpop.eup %2992 }
 0x68f   : > { %v2270_v1 = vpack.c.bf16 %v2993_v42, %v2993_v42 }
 0x691   : > { %2722 = vmatmul.mubr.bf16.vlgmr.msra.gmra.mrb[24].mxu1 %v2270_v1 }
 0x764   : > { %v2370_v3 = vpop.f32.mrb[24].mxu1 }
 0x765   : > { %v2371_v4 = vadd.f32 %v2370_v3, %v2287_v47  ;;  %v2723_v2 = vpop.f32.mrb[25].mxu1 }
 0x766   : > { %v2373_v6 = vpop.f32.mrb[26].mxu1 }
 0x767   : > { %2376 = vst [vmem:[%s378_s13] sm:$0x1] %v2371_v4  ;;  %v2724_v7 = vpop.f32.mrb[27].mxu1 }
 0x768   : > { %3007 = shalt.err (!%p3004_p3)
}
 0x769   : > { %s3008_s19 = scalar_lea.hbm %s3860_s15, 16  ;;  %s3012_s13 = scalar_lea.hbm %s3913_s11, 32 }
 0x76a   : > { %p3009_p4 = scmp.ne.s32.totalorder %s3860_s15, %s3008_s19  ;;  %p3013_p9 = scmp.lt.u32.totalorder %s3860_s15, %s3913_s11 }
 0x76b   : > { %p3014_p10 = scmp.lt.u32.totalorder %s3012_s13, %s3008_s19  ;;  %p3016_p12 = scmp.lt.u32.totalorder %s3008_s19, %s3860_s15 }
 0x76c   : > { %p3010_p7 = pnand %p3009_p4, %p3169_p5 }
 0x76d   : > { %p3015_p11 = por %p3014_p10, %p3013_p9 }
 0x76e   : > { %p3011_p8 = pneg %p3010_p7 }
 0x76f   : > { %p3017_p13 = por %p3016_p12, %p3015_p11 }
 0x771   : > { %p3018_p0 = pnand %p3017_p13, %p3011_p8 }
 0x773   : > { %3021 = shalt.err (!%p3018_p0)
}
 0x774   : > { %2725 = dma.vmem_to_hbm [thread:$0]  (%p3169_p5), %s3862_s26, 16, %s3860_s15, %s2378_s12  }
 0x775 PF: > { %p2731_p1 = scmp.ge.s32.totalorder %s3056_s20, 2  ;;  %s2402_s21 = sand.u32 1, %s3044_s17  }
 0x776   : > { %s2403_s29 = scalar_lea.sflag [#allocation3], %s2402_s21 }
 0x777   : > { %p2728_p2 = pnand %p2731_p1, %p3173_p6 }
 0x779   : > { %3039 = dma.done.wait (!%p2728_p2), %s2403_s29, 16  }
 0x77a   : > { %3041 = vsyncadd (!%p2728_p2), %s2403_s29, 4294967280  ;;  %s3919_s30 = sld [smem:[#allocation5_spill]]  ;;  %s3920_s19 = sld [smem:[#allocation6_spill]] }
 0x77b   : > { %p21_p3 = scmp.ge.s32.totalorder %s3156_s23, 4   ;;  %s3921_s17 = smov %s3048_s18 }
 0x77c   : > { %s3923_s20 = smov %s3156_s23 }
 0x77d   :  { %23 = sbr.rel (!%p21_p3) target bundleno = 3 (0x3), region = 99 }
 0x780   : > { %s3922_s18 = smov %s3919_s30 }
 0x784   :  { %2407 = vsyncpa [#allocation3], 1 }
 0x785   :  { %2409 = vsyncpa [#allocation3 + $0x1], 1 }

</bundles_post_ra>
